<compile_context>
chip_gen: v7x
topology: tpu7x:2x2x1
jax: 0.10.0
libtpu: 0.0.40
codegen_flags: <defaults>
</compile_context>

<pallas_src>
import jax
import jax.numpy as jnp
from jax import lax
from jax.experimental import pallas as pl
from jax.experimental.pallas import tpu as pltpu


# ----------------------------- Pallas kernel -------------------------------

def _make_fused_attn_kernel(heads, dim_head, scale, project_out):
    inner = heads * dim_head

    def _attend(x_ref, wqkv_ref, wout_ref, bout_ref, o_ref):
        cdt = x_ref.dtype                       # MXU operand dtype (f32 or bf16)
        bb, n, dim = x_ref.shape                # batch-block, tokens, model dim
        rows = bb * n
        out_cols = o_ref.shape[-1]

        # Single large qkv projection (f32 accumulation on the MXU).
        xf = x_ref[...].reshape(rows, dim)      # merge (bb, N) -> sublane rows
        qkv = jnp.dot(xf, wqkv_ref[...],
                      preferred_element_type=jnp.float32)   # (rows, 3*inner) f32

        acc = jnp.zeros((rows, out_cols), jnp.float32)
        for h in range(heads):                  # heads is small -> static unroll
            lo = h * dim_head
            hi = lo + dim_head
            # Fold softmax scale into q (rows*D mults instead of rows*N).
            q = (qkv[:, lo:hi] * scale).astype(cdt).reshape(bb, n, dim_head)
            k = qkv[:, inner + lo:inner + hi].astype(cdt).reshape(bb, n, dim_head)
            v = qkv[:, 2 * inner + lo:2 * inner + hi].astype(cdt).reshape(
                bb, n, dim_head)

            # Batched q @ k^T over the batch block (no materialized transpose).
            s = lax.dot_general(q, k, (((2,), (2,)), ((0,), (0,))),
                                preferred_element_type=jnp.float32)  # (bb,N,N)

            # Softmax kept in f32 (VPU/EUP); approx reciprocal rides the EUP slot.
            m = jnp.max(s, axis=-1, keepdims=True)
            p = jnp.exp(s - m)
            denom = jnp.sum(p, axis=-1, keepdims=True)
            attn = (p * pl.reciprocal(denom, approx=True)).astype(cdt)

            o_h = lax.dot_general(attn, v, (((2,), (1,)), ((0,), (0,))),
                                  preferred_element_type=jnp.float32)  # (bb,N,D)
            o_flat = o_h.reshape(rows, dim_head)
            if project_out:
                # Fused output projection: reduce heads into an f32 accumulator.
                acc = acc + jnp.dot(o_flat.astype(cdt), wout_ref[lo:hi, :],
                                    preferred_element_type=jnp.float32)
            else:
                acc = o_flat                    # heads == 1 -> to_out == Identity

        if project_out:
            acc = acc + bout_ref[...].astype(jnp.float32)
        o_ref[...] = acc.reshape(bb, n, out_cols).astype(o_ref.dtype)

    if project_out:
        def kernel(x_ref, wqkv_ref, wout_ref, bout_ref, o_ref):
            _attend(x_ref, wqkv_ref, wout_ref, bout_ref, o_ref)
    else:
        def kernel(x_ref, wqkv_ref, o_ref):
            _attend(x_ref, wqkv_ref, None, None, o_ref)
    return kernel


# ------------------------------ JAX wrapper ---------------------------------

def _vmem_estimate(bb, N, dim, inner, out_cols, itemsize, project_out):
    rows = bb * N
    est = (2 * bb * N * dim * itemsize            # x block, double-buffered
           + 2 * bb * N * out_cols * itemsize     # out block, double-buffered
           + dim * 3 * inner * itemsize           # resident qkv weight
           + ((inner * out_cols + out_cols) * itemsize if project_out else 0)
           + rows * 3 * inner * 4                 # f32 qkv intermediate
           + bb * N * N * 4                       # f32 scores (one head live)
           + rows * out_cols * 4                  # f32 accumulator
           + 3 * rows * max(inner, 1) * 4 // max(1, inner // max(1, out_cols)))
    return est


def _pick_batch_block(B, N, dim, inner, out_cols, itemsize, project_out):
    # Enough rows per grid step to amortize the ~0.35us step overhead and feed
    # the MXU, but keep the f32 intermediates well inside VMEM.
    target_rows = 512
    bb = max(1, min(B, max(1, target_rows // max(N, 1)), 64))
    while bb > 1 and _vmem_estimate(bb, N, dim, inner, out_cols, itemsize,
                                    project_out) > 24 * 2**20:
        bb //= 2
    return bb


def fused_attention(x, w_qkv, w_out, b_out, *, heads, dim_head, scale):
    """x: (B, N, dim); w_qkv: (dim, 3*inner) == W^T; w_out: (inner, dim) or None;
    b_out: (dim,) or None.  Returns (B, N, dim) (or (B, N, inner) if no proj)."""
    B, N, dim = x.shape
    inner = heads * dim_head
    project_out = w_out is not None
    out_cols = dim if project_out else inner
    itemsize = x.dtype.itemsize

    bb = _pick_batch_block(B, N, dim, inner, out_cols, itemsize, project_out)
    Bp = ((B + bb - 1) // bb) * bb
    if Bp != B:
        # Zero-pad the batch; padded rows produce garbage-free (bias-only)
        # outputs that are sliced off below.
        x = jnp.pad(x, ((0, Bp - B), (0, 0), (0, 0)))

    kernel = _make_fused_attn_kernel(heads, dim_head, scale, project_out)

    est = _vmem_estimate(bb, N, dim, inner, out_cols, itemsize, project_out)
    vmem_limit = int(min(48 * 2**20, max(32 * 2**20, 3 * est)))

    if project_out:
        in_specs = [
            pl.BlockSpec((bb, N, dim), lambda b: (b, 0, 0)),      # x block
            pl.BlockSpec((dim, 3 * inner), lambda b: (0, 0)),     # W_qkv (resident)
            pl.BlockSpec((inner, dim), lambda b: (0, 0)),         # W_out (resident)
            pl.BlockSpec((1, dim), lambda b: (0, 0)),             # b_out
        ]
        args = (x, w_qkv, w_out, b_out.reshape(1, dim))
    else:
        in_specs = [
            pl.BlockSpec((bb, N, dim), lambda b: (b, 0, 0)),
            pl.BlockSpec((dim, 3 * inner), lambda b: (0, 0)),
        ]
        args = (x, w_qkv)

    out = pl.pallas_call(
        kernel,
        out_shape=jax.ShapeDtypeStruct((Bp, N, out_cols), x.dtype),
        grid=(Bp // bb,),
        in_specs=in_specs,
        out_specs=pl.BlockSpec((bb, N, out_cols), lambda b: (b, 0, 0)),
        compiler_params=pltpu.CompilerParams(
            dimension_semantics=("parallel",),
            vmem_limit_bytes=vmem_limit),
    )(*args)

    if Bp != B:
        out = out[:B]
    return out


class AttentionPallas:
    """JAX/Pallas port of the PyTorch TSViT Attention module."""

    def __init__(self, dim, heads=8, dim_head=64, dropout=0.0, key=None,
                 dtype=jnp.float32):
        inner_dim = dim_head * heads
        self.dim = dim
        self.heads = heads
        self.dim_head = dim_head
        self.inner_dim = inner_dim
        self.scale = dim_head ** (-0.5)
        self.dtype = dtype
        self.project_out = not (heads == 1 and dim_head == dim)
        # TODO(synk): Dropout is identity for p=0.0 / inference; not implemented.

        if key is None:
            key = jax.random.PRNGKey(0)
        k1, k2, k3 = jax.random.split(key, 3)
        # PyTorch nn.Linear default init: U(-1/sqrt(fan_in), 1/sqrt(fan_in)).
        bound_qkv = 1.0 / (dim ** 0.5)
        # stored pre-transposed as (in_features, out_features) == W^T
        self.w_qkv = jax.random.uniform(
            k1, (dim, inner_dim * 3), jnp.float32, -bound_qkv, bound_qkv
        ).astype(dtype)
        if self.project_out:
            bound_out = 1.0 / (inner_dim ** 0.5)
            self.w_out = jax.random.uniform(
                k2, (inner_dim, dim), jnp.float32, -bound_out, bound_out
            ).astype(dtype)
            self.b_out = jax.random.uniform(
                k3, (dim,), jnp.float32, -bound_out, bound_out).astype(dtype)
        else:
            self.w_out = None
            self.b_out = None

    def __call__(self, x):
        # x: (B, N, DIM)
        x = x.astype(self.dtype)
        return fused_attention(x, self.w_qkv, self.w_out, self.b_out,
                               heads=self.heads, dim_head=self.dim_head,
                               scale=self.scale)


# ------------------------------ reference check -----------------------------

def attention_ref(module: AttentionPallas, x):
    """Pure-JAX f32 reference matching the PyTorch module semantics."""
    f32 = jnp.float32
    B, N, _ = x.shape
    H, D = module.heads, module.dim_head
    xf = x.astype(f32)
    qkv = xf @ module.w_qkv.astype(f32)
    q, k, v = jnp.split(qkv, 3, axis=-1)
    q = q.reshape(B, N, H, D).transpose(0, 2, 1, 3)
    k = k.reshape(B, N, H, D).transpose(0, 2, 1, 3)
    v = v.reshape(B, N, H, D).transpose(0, 2, 1, 3)
    dots = jnp.einsum('bhid,bhjd->bhij', q, k) * module.scale
    attn = jax.nn.softmax(dots, axis=-1)
    out = jnp.einsum('bhij,bhjd->bhid', attn, v)
    out = out.transpose(0, 2, 1, 3).reshape(B, N, module.inner_dim)
    if module.project_out:
        out = out @ module.w_out.astype(f32) + module.b_out.astype(f32)
    return out


if __name__ == "__main__":
    # small shapes: batch=2, tokens=16, dim=128, heads=4, dim_head=64
    B, N, DIM = 2, 16, 128
    HEADS, DIM_HEAD = 4, 64

    key = jax.random.PRNGKey(0)
    kx, kp = jax.random.split(key)
    x = jax.random.normal(kx, (B, N, DIM), jnp.float32)

    # f32 path (matches PyTorch defaults).
    module = AttentionPallas(DIM, heads=HEADS, dim_head=DIM_HEAD, key=kp)
    out = jax.block_until_ready(module(x))
    ref = attention_ref(module, x)
    assert out.shape == (B, N, DIM), out.shape
    # Tolerance covers the EUP approximate reciprocal in the softmax.
    assert jnp.allclose(out, ref, atol=1e-2, rtol=1e-2), "f32 mismatch vs reference"

    # bf16 MXU fast path (bf16 operands, f32 accumulation, f32 softmax).
    module_bf16 = AttentionPallas(DIM, heads=HEADS, dim_head=DIM_HEAD, key=kp,
                                  dtype=jnp.bfloat16)
    out_bf16 = jax.block_until_ready(module_bf16(x.astype(jnp.bfloat16)))
    ref_bf16 = attention_ref(module_bf16, x.astype(jnp.bfloat16))
    assert out_bf16.shape == (B, N, DIM), out_bf16.shape
    assert jnp.allclose(out_bf16.astype(jnp.float32), ref_bf16,
                        atol=5e-2, rtol=5e-2), "bf16 mismatch vs reference"

    # larger effective batch: exercises batch-blocking + zero-pad path.
    B2 = 33
    x2 = jax.random.normal(jax.random.PRNGKey(1), (B2, N, DIM), jnp.float32)
    out2 = jax.block_until_ready(module(x2))
    ref2 = attention_ref(module, x2)
    assert out2.shape == (B2, N, DIM), out2.shape
    assert jnp.allclose(out2, ref2, atol=1e-2, rtol=1e-2), "blocked-batch mismatch"

    print("KERNEL_OK")
</pallas_src>

<mosaic_0001>
module attributes {stable_mosaic.version = 11 : i64} {
  func.func @kernel(%arg0: i32, %arg1: memref<2x16x128xf32, #tpu.memory_space<vmem>>, %arg2: memref<128x768xf32, #tpu.memory_space<vmem>>, %arg3: memref<256x128xf32, #tpu.memory_space<vmem>>, %arg4: memref<1x128xf32, #tpu.memory_space<vmem>>, %arg5: memref<2x16x128xf32, #tpu.memory_space<vmem>>) attributes {dimension_semantics = [#tpu.dimension_semantics<parallel>], iteration_bounds = array<i64: 1>, scalar_prefetch = 0 : i64, scratch_operands = 0 : i64, tpu.core_type = #tpu.core_type<tc>, window_params = [{transform_indices = @transform_0, window_bounds = array<i64: 2, 16, 128>}, {pipeline_mode = #tpu.pipeline_mode<synchronous>, transform_indices = @transform_1, window_bounds = array<i64: 128, 768>}, {pipeline_mode = #tpu.pipeline_mode<synchronous>, transform_indices = @transform_2, window_bounds = array<i64: 256, 128>}, {pipeline_mode = #tpu.pipeline_mode<synchronous>, transform_indices = @transform_3, window_bounds = array<i64: 1, 128>}, {transform_indices = @transform_4, window_bounds = array<i64: 2, 16, 128>}]} {
    %c0 = arith.constant 0 : index
    %c0_0 = arith.constant 0 : index
    %c0_1 = arith.constant 0 : index
    %0 = vector.load %arg1[%c0, %c0_0, %c0_1] : memref<2x16x128xf32, #tpu.memory_space<vmem>>, vector<2x16x128xf32>
    %1 = vector.shape_cast %0 : vector<2x16x128xf32> to vector<32x128xf32>
    %c0_2 = arith.constant 0 : index
    %c0_3 = arith.constant 0 : index
    %2 = vector.load %arg2[%c0_2, %c0_3] : memref<128x768xf32, #tpu.memory_space<vmem>>, vector<128x768xf32>
    %cst = arith.constant dense<0.000000e+00> : vector<32x768xf32>
    %3 = tpu.matmul %1, %2, %cst {dimension_numbers = #tpu.dot_dimension_numbers<[1], [0], [0], [1], [0, 0, 1, 1], [], []>} : vector<32x128xf32>, vector<128x768xf32>, vector<32x768xf32> -> vector<32x768xf32>
    %cst_4 = arith.constant 0.000000e+00 : f32
    %4 = vector.broadcast %cst_4 : f32 to vector<32x128xf32>
    %5 = vector.extract_strided_slice %3 {offsets = [0, 0], sizes = [32, 64], strides = [1, 1]} : vector<32x768xf32> to vector<32x64xf32>
    %cst_5 = arith.constant 1.250000e-01 : f32
    %6 = vector.broadcast %cst_5 : f32 to vector<32x64xf32>
    %7 = arith.mulf %5, %6 : vector<32x64xf32>
    %8 = vector.shape_cast %7 : vector<32x64xf32> to vector<2x16x64xf32>
    %9 = vector.extract_strided_slice %3 {offsets = [0, 256], sizes = [32, 64], strides = [1, 1]} : vector<32x768xf32> to vector<32x64xf32>
    %10 = vector.shape_cast %9 : vector<32x64xf32> to vector<2x16x64xf32>
    %11 = vector.extract_strided_slice %3 {offsets = [0, 512], sizes = [32, 64], strides = [1, 1]} : vector<32x768xf32> to vector<32x64xf32>
    %12 = vector.shape_cast %11 : vector<32x64xf32> to vector<2x16x64xf32>
    %cst_6 = arith.constant dense<0.000000e+00> : vector<2x16x16xf32>
    %13 = tpu.matmul %8, %10, %cst_6 {dimension_numbers = #tpu.dot_dimension_numbers<[2], [2], [1], [1], [0, 0, 0, 1, 1, 1], [0], [0]>} : vector<2x16x64xf32>, vector<2x16x64xf32>, vector<2x16x16xf32> -> vector<2x16x16xf32>
    %cst_7 = arith.constant dense<0xFF800000> : vector<2x16xf32>
    %14 = vector.multi_reduction <maximumf>, %13, %cst_7 [2] : vector<2x16x16xf32> to vector<2x16xf32>
    %15 = vector.shape_cast %14 : vector<2x16xf32> to vector<2x16x1xf32>
    %16 = vector.broadcast %15 : vector<2x16x1xf32> to vector<2x16x16xf32>
    %17 = arith.subf %13, %16 : vector<2x16x16xf32>
    %18 = math.exp %17 : vector<2x16x16xf32>
    %cst_8 = arith.constant dense<0.000000e+00> : vector<2x16xf32>
    %19 = vector.multi_reduction <add>, %18, %cst_8 [2] : vector<2x16x16xf32> to vector<2x16xf32>
    %20 = vector.shape_cast %19 : vector<2x16xf32> to vector<2x16x1xf32>
    %21 = tpu.reciprocal %20 {approx = true} : vector<2x16x1xf32> -> vector<2x16x1xf32>
    %22 = vector.broadcast %21 : vector<2x16x1xf32> to vector<2x16x16xf32>
    %23 = arith.mulf %18, %22 : vector<2x16x16xf32>
    %cst_9 = arith.constant dense<0.000000e+00> : vector<2x16x64xf32>
    %24 = tpu.matmul %23, %12, %cst_9 {dimension_numbers = #tpu.dot_dimension_numbers<[2], [1], [1], [2], [0, 0, 0, 1, 1, 2], [0], [0]>} : vector<2x16x16xf32>, vector<2x16x64xf32>, vector<2x16x64xf32> -> vector<2x16x64xf32>
    %25 = vector.shape_cast %24 : vector<2x16x64xf32> to vector<32x64xf32>
    %c0_10 = arith.constant 0 : index
    %c0_11 = arith.constant 0 : index
    %26 = vector.load %arg3[%c0_10, %c0_11] : memref<256x128xf32, #tpu.memory_space<vmem>>, vector<64x128xf32>
    %cst_12 = arith.constant dense<0.000000e+00> : vector<32x128xf32>
    %27 = tpu.matmul %25, %26, %cst_12 {dimension_numbers = #tpu.dot_dimension_numbers<[1], [0], [0], [1], [0, 0, 1, 1], [], []>} : vector<32x64xf32>, vector<64x128xf32>, vector<32x128xf32> -> vector<32x128xf32>
    %28 = arith.addf %4, %27 : vector<32x128xf32>
    %29 = vector.extract_strided_slice %3 {offsets = [0, 64], sizes = [32, 64], strides = [1, 1]} : vector<32x768xf32> to vector<32x64xf32>
    %cst_13 = arith.constant 1.250000e-01 : f32
    %30 = vector.broadcast %cst_13 : f32 to vector<32x64xf32>
    %31 = arith.mulf %29, %30 : vector<32x64xf32>
    %32 = vector.shape_cast %31 : vector<32x64xf32> to vector<2x16x64xf32>
    %33 = vector.extract_strided_slice %3 {offsets = [0, 320], sizes = [32, 64], strides = [1, 1]} : vector<32x768xf32> to vector<32x64xf32>
    %34 = vector.shape_cast %33 : vector<32x64xf32> to vector<2x16x64xf32>
    %35 = vector.extract_strided_slice %3 {offsets = [0, 576], sizes = [32, 64], strides = [1, 1]} : vector<32x768xf32> to vector<32x64xf32>
    %36 = vector.shape_cast %35 : vector<32x64xf32> to vector<2x16x64xf32>
    %cst_14 = arith.constant dense<0.000000e+00> : vector<2x16x16xf32>
    %37 = tpu.matmul %32, %34, %cst_14 {dimension_numbers = #tpu.dot_dimension_numbers<[2], [2], [1], [1], [0, 0, 0, 1, 1, 1], [0], [0]>} : vector<2x16x64xf32>, vector<2x16x64xf32>, vector<2x16x16xf32> -> vector<2x16x16xf32>
    %cst_15 = arith.constant dense<0xFF800000> : vector<2x16xf32>
    %38 = vector.multi_reduction <maximumf>, %37, %cst_15 [2] : vector<2x16x16xf32> to vector<2x16xf32>
    %39 = vector.shape_cast %38 : vector<2x16xf32> to vector<2x16x1xf32>
    %40 = vector.broadcast %39 : vector<2x16x1xf32> to vector<2x16x16xf32>
    %41 = arith.subf %37, %40 : vector<2x16x16xf32>
    %42 = math.exp %41 : vector<2x16x16xf32>
    %cst_16 = arith.constant dense<0.000000e+00> : vector<2x16xf32>
    %43 = vector.multi_reduction <add>, %42, %cst_16 [2] : vector<2x16x16xf32> to vector<2x16xf32>
    %44 = vector.shape_cast %43 : vector<2x16xf32> to vector<2x16x1xf32>
    %45 = tpu.reciprocal %44 {approx = true} : vector<2x16x1xf32> -> vector<2x16x1xf32>
    %46 = vector.broadcast %45 : vector<2x16x1xf32> to vector<2x16x16xf32>
    %47 = arith.mulf %42, %46 : vector<2x16x16xf32>
    %cst_17 = arith.constant dense<0.000000e+00> : vector<2x16x64xf32>
    %48 = tpu.matmul %47, %36, %cst_17 {dimension_numbers = #tpu.dot_dimension_numbers<[2], [1], [1], [2], [0, 0, 0, 1, 1, 2], [0], [0]>} : vector<2x16x16xf32>, vector<2x16x64xf32>, vector<2x16x64xf32> -> vector<2x16x64xf32>
    %49 = vector.shape_cast %48 : vector<2x16x64xf32> to vector<32x64xf32>
    %c64 = arith.constant 64 : index
    %c0_18 = arith.constant 0 : index
    %50 = vector.load %arg3[%c64, %c0_18] : memref<256x128xf32, #tpu.memory_space<vmem>>, vector<64x128xf32>
    %cst_19 = arith.constant dense<0.000000e+00> : vector<32x128xf32>
    %51 = tpu.matmul %49, %50, %cst_19 {dimension_numbers = #tpu.dot_dimension_numbers<[1], [0], [0], [1], [0, 0, 1, 1], [], []>} : vector<32x64xf32>, vector<64x128xf32>, vector<32x128xf32> -> vector<32x128xf32>
    %52 = arith.addf %28, %51 : vector<32x128xf32>
    %53 = vector.extract_strided_slice %3 {offsets = [0, 128], sizes = [32, 64], strides = [1, 1]} : vector<32x768xf32> to vector<32x64xf32>
    %cst_20 = arith.constant 1.250000e-01 : f32
    %54 = vector.broadcast %cst_20 : f32 to vector<32x64xf32>
    %55 = arith.mulf %53, %54 : vector<32x64xf32>
    %56 = vector.shape_cast %55 : vector<32x64xf32> to vector<2x16x64xf32>
    %57 = vector.extract_strided_slice %3 {offsets = [0, 384], sizes = [32, 64], strides = [1, 1]} : vector<32x768xf32> to vector<32x64xf32>
    %58 = vector.shape_cast %57 : vector<32x64xf32> to vector<2x16x64xf32>
    %59 = vector.extract_strided_slice %3 {offsets = [0, 640], sizes = [32, 64], strides = [1, 1]} : vector<32x768xf32> to vector<32x64xf32>
    %60 = vector.shape_cast %59 : vector<32x64xf32> to vector<2x16x64xf32>
    %cst_21 = arith.constant dense<0.000000e+00> : vector<2x16x16xf32>
    %61 = tpu.matmul %56, %58, %cst_21 {dimension_numbers = #tpu.dot_dimension_numbers<[2], [2], [1], [1], [0, 0, 0, 1, 1, 1], [0], [0]>} : vector<2x16x64xf32>, vector<2x16x64xf32>, vector<2x16x16xf32> -> vector<2x16x16xf32>
    %cst_22 = arith.constant dense<0xFF800000> : vector<2x16xf32>
    %62 = vector.multi_reduction <maximumf>, %61, %cst_22 [2] : vector<2x16x16xf32> to vector<2x16xf32>
    %63 = vector.shape_cast %62 : vector<2x16xf32> to vector<2x16x1xf32>
    %64 = vector.broadcast %63 : vector<2x16x1xf32> to vector<2x16x16xf32>
    %65 = arith.subf %61, %64 : vector<2x16x16xf32>
    %66 = math.exp %65 : vector<2x16x16xf32>
    %cst_23 = arith.constant dense<0.000000e+00> : vector<2x16xf32>
    %67 = vector.multi_reduction <add>, %66, %cst_23 [2] : vector<2x16x16xf32> to vector<2x16xf32>
    %68 = vector.shape_cast %67 : vector<2x16xf32> to vector<2x16x1xf32>
    %69 = tpu.reciprocal %68 {approx = true} : vector<2x16x1xf32> -> vector<2x16x1xf32>
    %70 = vector.broadcast %69 : vector<2x16x1xf32> to vector<2x16x16xf32>
    %71 = arith.mulf %66, %70 : vector<2x16x16xf32>
    %cst_24 = arith.constant dense<0.000000e+00> : vector<2x16x64xf32>
    %72 = tpu.matmul %71, %60, %cst_24 {dimension_numbers = #tpu.dot_dimension_numbers<[2], [1], [1], [2], [0, 0, 0, 1, 1, 2], [0], [0]>} : vector<2x16x16xf32>, vector<2x16x64xf32>, vector<2x16x64xf32> -> vector<2x16x64xf32>
    %73 = vector.shape_cast %72 : vector<2x16x64xf32> to vector<32x64xf32>
    %c128 = arith.constant 128 : index
    %c0_25 = arith.constant 0 : index
    %74 = vector.load %arg3[%c128, %c0_25] : memref<256x128xf32, #tpu.memory_space<vmem>>, vector<64x128xf32>
    %cst_26 = arith.constant dense<0.000000e+00> : vector<32x128xf32>
    %75 = tpu.matmul %73, %74, %cst_26 {dimension_numbers = #tpu.dot_dimension_numbers<[1], [0], [0], [1], [0, 0, 1, 1], [], []>} : vector<32x64xf32>, vector<64x128xf32>, vector<32x128xf32> -> vector<32x128xf32>
    %76 = arith.addf %52, %75 : vector<32x128xf32>
    %77 = vector.extract_strided_slice %3 {offsets = [0, 192], sizes = [32, 64], strides = [1, 1]} : vector<32x768xf32> to vector<32x64xf32>
    %cst_27 = arith.constant 1.250000e-01 : f32
    %78 = vector.broadcast %cst_27 : f32 to vector<32x64xf32>
    %79 = arith.mulf %77, %78 : vector<32x64xf32>
    %80 = vector.shape_cast %79 : vector<32x64xf32> to vector<2x16x64xf32>
    %81 = vector.extract_strided_slice %3 {offsets = [0, 448], sizes = [32, 64], strides = [1, 1]} : vector<32x768xf32> to vector<32x64xf32>
    %82 = vector.shape_cast %81 : vector<32x64xf32> to vector<2x16x64xf32>
    %83 = vector.extract_strided_slice %3 {offsets = [0, 704], sizes = [32, 64], strides = [1, 1]} : vector<32x768xf32> to vector<32x64xf32>
    %84 = vector.shape_cast %83 : vector<32x64xf32> to vector<2x16x64xf32>
    %cst_28 = arith.constant dense<0.000000e+00> : vector<2x16x16xf32>
    %85 = tpu.matmul %80, %82, %cst_28 {dimension_numbers = #tpu.dot_dimension_numbers<[2], [2], [1], [1], [0, 0, 0, 1, 1, 1], [0], [0]>} : vector<2x16x64xf32>, vector<2x16x64xf32>, vector<2x16x16xf32> -> vector<2x16x16xf32>
    %cst_29 = arith.constant dense<0xFF800000> : vector<2x16xf32>
    %86 = vector.multi_reduction <maximumf>, %85, %cst_29 [2] : vector<2x16x16xf32> to vector<2x16xf32>
    %87 = vector.shape_cast %86 : vector<2x16xf32> to vector<2x16x1xf32>
    %88 = vector.broadcast %87 : vector<2x16x1xf32> to vector<2x16x16xf32>
    %89 = arith.subf %85, %88 : vector<2x16x16xf32>
    %90 = math.exp %89 : vector<2x16x16xf32>
    %cst_30 = arith.constant dense<0.000000e+00> : vector<2x16xf32>
    %91 = vector.multi_reduction <add>, %90, %cst_30 [2] : vector<2x16x16xf32> to vector<2x16xf32>
    %92 = vector.shape_cast %91 : vector<2x16xf32> to vector<2x16x1xf32>
    %93 = tpu.reciprocal %92 {approx = true} : vector<2x16x1xf32> -> vector<2x16x1xf32>
    %94 = vector.broadcast %93 : vector<2x16x1xf32> to vector<2x16x16xf32>
    %95 = arith.mulf %90, %94 : vector<2x16x16xf32>
    %cst_31 = arith.constant dense<0.000000e+00> : vector<2x16x64xf32>
    %96 = tpu.matmul %95, %84, %cst_31 {dimension_numbers = #tpu.dot_dimension_numbers<[2], [1], [1], [2], [0, 0, 0, 1, 1, 2], [0], [0]>} : vector<2x16x16xf32>, vector<2x16x64xf32>, vector<2x16x64xf32> -> vector<2x16x64xf32>
    %97 = vector.shape_cast %96 : vector<2x16x64xf32> to vector<32x64xf32>
    %c192 = arith.constant 192 : index
    %c0_32 = arith.constant 0 : index
    %98 = vector.load %arg3[%c192, %c0_32] : memref<256x128xf32, #tpu.memory_space<vmem>>, vector<64x128xf32>
    %cst_33 = arith.constant dense<0.000000e+00> : vector<32x128xf32>
    %99 = tpu.matmul %97, %98, %cst_33 {dimension_numbers = #tpu.dot_dimension_numbers<[1], [0], [0], [1], [0, 0, 1, 1], [], []>} : vector<32x64xf32>, vector<64x128xf32>, vector<32x128xf32> -> vector<32x128xf32>
    %100 = arith.addf %76, %99 : vector<32x128xf32>
    %c0_34 = arith.constant 0 : index
    %c0_35 = arith.constant 0 : index
    %101 = vector.load %arg4[%c0_34, %c0_35] : memref<1x128xf32, #tpu.memory_space<vmem>>, vector<1x128xf32>
    %102 = vector.broadcast %101 : vector<1x128xf32> to vector<32x128xf32>
    %103 = arith.addf %100, %102 : vector<32x128xf32>
    %104 = vector.shape_cast %103 : vector<32x128xf32> to vector<2x16x128xf32>
    %c0_36 = arith.constant 0 : index
    %c0_37 = arith.constant 0 : index
    %c0_38 = arith.constant 0 : index
    %105 = vector.load %arg5[%c0_36, %c0_37, %c0_38] : memref<2x16x128xf32, #tpu.memory_space<vmem>>, vector<2x16x128xf32>
    tpu.vector_store %arg5[%c0_36, %c0_37, %c0_38], %104 {strides = array<i32>} : memref<2x16x128xf32, #tpu.memory_space<vmem>>, vector<2x16x128xf32>,
    return
  }
  func.func @transform_0(%arg0: i32) -> (i32, i32, i32) {
    %c0_i32 = arith.constant 0 : i32
    %c0_i32_0 = arith.constant 0 : i32
    %c0_i32_1 = arith.constant 0 : i32
    return %arg0, %c0_i32, %c0_i32_0 : i32, i32, i32
  }
  func.func @transform_1(%arg0: i32) -> (i32, i32) {
    %c0_i32 = arith.constant 0 : i32
    %c0_i32_0 = arith.constant 0 : i32
    %c0_i32_1 = arith.constant 0 : i32
    return %c0_i32, %c0_i32_0 : i32, i32
  }
  func.func @transform_2(%arg0: i32) -> (i32, i32) {
    %c0_i32 = arith.constant 0 : i32
    %c0_i32_0 = arith.constant 0 : i32
    %c0_i32_1 = arith.constant 0 : i32
    return %c0_i32, %c0_i32_0 : i32, i32
  }
  func.func @transform_3(%arg0: i32) -> (i32, i32) {
    %c0_i32 = arith.constant 0 : i32
    %c0_i32_0 = arith.constant 0 : i32
    %c0_i32_1 = arith.constant 0 : i32
    return %c0_i32, %c0_i32_0 : i32, i32
  }
  func.func @transform_4(%arg0: i32) -> (i32, i32, i32) {
    %c0_i32 = arith.constant 0 : i32
    %c0_i32_0 = arith.constant 0 : i32
    %c0_i32_1 = arith.constant 0 : i32
    return %arg0, %c0_i32, %c0_i32_0 : i32, i32, i32
  }
}

</mosaic_0001>

<bundles_post_ra>
// kernel: tpu_custom_call.1
= control target key start
LH: loop header
LB: loop body
LE: loop exit
PB: predicated region body
PF: predicated region fallthrough
CT: control target
= control target key end

     0   :  { %9 = vsyncpa [#allocation3], 0  ;;  %s3723_s0 = inlined_call_operand.hbm [shape: f32[2,16,128], index: 0, kind: input, shape index: {}]   ;;  %s3724_s1 = inlined_call_operand.hbm [shape: f32[128,768], index: 1, kind: input, shape index: {}]   ;;  %s3725_s2 = inlined_call_operand.hbm [shape: f32[256,128], index: 2, kind: input, shape index: {}]   ;;  %s3726_s3 = inlined_call_operand.vmem [shape: f32[1,128], index: 3, kind: input, shape index: {}]   ;;  %s3727_s4 = inlined_call_operand.hbm [shape: f32[2,16,128], index: 4, kind: output, shape index: {}]  }
   0x1   :  { %10 = vsyncpa [#allocation6], 0 }
   0x2   :  { %11 = vsyncpa [#allocation4], 0  ;;  %s3302_s15 = smov [#allocation5]   ;;  %s3208_s19 = scalar_lea.hbm %s3724_s1, 12288 }
   0x3   :  { %s29_s16 = sshll.u32 %s3302_s15, 4  ;;  %p3209_p0 = scmp.ne.s32.totalorder %s3724_s1, %s3208_s19  ;;  %s30_s16 = int_to_ptr.vmem [resolvable:$true] %s29_s16 }
   0x4   :  { %p3212_p1 = scmp.lt.u32.totalorder %s3208_s19, %s3724_s1 }
   0x6   :  { %p3214_p2 = pnand %p3212_p1, %p3209_p0 }
   0x8   :  { %3217 = shalt.err (!%p3214_p2)
}
   0x9   :  { %s3218_s24 = scalar_lea.vmem %s30_s16, 12288  ;;  %p3223_p4 = scmp.lt.s32.totalorder %s30_s16, %s30_s16 }
   0xa   :  { %p3219_p3 = scmp.ne.s32.totalorder %s30_s16, %s3218_s24  ;;  %p3224_p5 = scmp.lt.s32.totalorder %s3218_s24, %s3218_s24 }
   0xc   :  { %p3225_p6 = por %p3224_p5, %p3223_p4 }
   0xe   :  { %p3226_p7 = pnand %p3225_p6, %p3219_p3 }
  0x10   :  { %3229 = shalt.err (!%p3226_p7)
}
  0x11   :  { %s3303_s25 = smov 768   ;;  %s3304_s26 = smov 48  }
  0x12   :  { %35 = dma.hbm_to_vmem [thread:$0]  %s3724_s1, 12288, %s30_s16, [#allocation6], %s3303_s25, %s3303_s25, %s3304_s26  }
  0x13   :  { %s3305_s29 = smov [#allocation2]   ;;  %s3230_s7 = scalar_lea.hbm %s3723_s0, 512 }
  0x14   :  { %s17_s30 = sshll.u32 %s3305_s29, 4  ;;  %p3231_p8 = scmp.ne.s32.totalorder %s3723_s0, %s3230_s7  ;;  %s18_s30 = int_to_ptr.vmem [resolvable:$true] %s17_s30 }
  0x15   :  { %p3234_p9 = scmp.lt.u32.totalorder %s3230_s7, %s3723_s0 }
  0x17   :  { %p3236_p10 = pnand %p3234_p9, %p3231_p8 }
  0x19   :  { %3239 = shalt.err (!%p3236_p10)
}
  0x1a   :  { %s3240_s12 = scalar_lea.vmem %s18_s30, 512  ;;  %p3245_p12 = scmp.lt.s32.totalorder %s18_s30, %s18_s30 }
  0x1b   :  { %p3241_p11 = scmp.ne.s32.totalorder %s18_s30, %s3240_s12  ;;  %p3246_p13 = scmp.lt.s32.totalorder %s3240_s12, %s3240_s12 }
  0x1d   :  { %p3247_p0 = por %p3246_p13, %p3245_p12 }
  0x1f   :  { %p3248_p1 = pnand %p3247_p0, %p3241_p11 }
  0x21   :  { %3251 = shalt.err (!%p3248_p1)
}
  0x22   :  { %s3306_s1 = smov 128   ;;  %s3307_s13 = smov 8  }
  0x23   :  { %23 = dma.hbm_to_vmem [thread:$0]  %s3723_s0, 512, %s18_s30, [#allocation3], %s3306_s1, %s3306_s1, %s3307_s13  }
  0x24   :  { %s3308_s16 = smov [#allocation7]   ;;  %s3252_s20 = scalar_lea.hbm %s3725_s2, 4096 }
  0x25   :  { %s41_s17 = sshll.u32 %s3308_s16, 4  ;;  %p3253_p2 = scmp.ne.s32.totalorder %s3725_s2, %s3252_s20  ;;  %s42_s17 = int_to_ptr.vmem [resolvable:$true] %s41_s17 }
  0x26   :  { %p3256_p3 = scmp.lt.u32.totalorder %s3252_s20, %s3725_s2 }
  0x28   :  { %p3258_p4 = pnand %p3256_p3, %p3253_p2 }
  0x2a   :  { %3261 = shalt.err (!%p3258_p4)
}
  0x2b   :  { %s3262_s25 = scalar_lea.vmem %s42_s17, 4096  ;;  %p3267_p6 = scmp.lt.s32.totalorder %s42_s17, %s42_s17 }
  0x2c   :  { %p3263_p5 = scmp.ne.s32.totalorder %s42_s17, %s3262_s25  ;;  %p3268_p7 = scmp.lt.s32.totalorder %s3262_s25, %s3262_s25 }
  0x2e   :  { %p3269_p8 = por %p3268_p7, %p3267_p6 }
  0x30   :  { %p3270_p9 = pnand %p3269_p8, %p3263_p5 }
  0x32   :  { %3273 = shalt.err (!%p3270_p9)
}
  0x33   :  { %47 = dma.hbm_to_vmem [thread:$0]  %s3725_s2, 4096, %s42_s17, [#allocation6], %s3306_s1, %s3306_s1, %s3307_s13  }
  0x34   :  { %3296 = dma.done.wait [#allocation3], 512  }
  0x35   :  { %3297 = vsyncadd [#allocation3], 4294966784 }
  0x36   :  { %3298 = dma.done.wait [#allocation6], 16384  }
  0x37   :  { %3299 = vsyncadd [#allocation6], 4294950912  ;;  %v3309_v0 = vmov 0.0   ;;  %v66_v1 = vld [vmem:[#allocation5 + $0x18] sm:$0xff]  ;;  %v72_v2 = vld [vmem:[#allocation5 + $0x48] sm:$0xff]  ;;  %vm430_vm0 = vcmask 523264  }
  0x38   :  { %312 = vmatprep.mubr.f32.mxu1 %v3309_v0  ;;  %223 = vmatprep.mubr.f32.mxu0 %v3309_v0  ;;  %v65_v3 = vld [vmem:[#allocation5 + $0x10] sm:$0xff]  ;;  %v2874_v4 = vpack.c.bf16 %v72_v2, %v66_v1  ;;  %v71_v5 = vld [vmem:[#allocation5 + $0x40] sm:$0xff]  ;;  %v78_v6 = vld [vmem:[#allocation5 + $0x78] sm:$0xff]  ;;  %vm605_vm2 = vcmask 130048   ;;  %s3310_s2 = smov 64   ;;  %s3311_s29 = smov [#allocation8]  }
  0x39   :  { %v84_v7 = vld [vmem:[#allocation5 + $0xa8] sm:$0xff]  ;;  %v2876_v8 = vpack.c.bf16 %v71_v5, %v65_v3  ;;  %v77_v10 = vld [vmem:[#allocation5 + $0x70] sm:$0xff]  ;;  %v83_v11 = vld [vmem:[#allocation5 + $0xa0] sm:$0xff]  ;;  %s2452_s30 = sshll.u32 %s3311_s29, 4  ;;  %s2453_s30 = int_to_ptr.vmem [resolvable:$true] %s2452_s30 }
  0x3a   :  { %v2878_v9 = vpack.c.bf16 %v84_v7, %v78_v6  ;;  %v64_v12 = vld [vmem:[#allocation5 + $0x8] sm:$0xff]  ;;  %2875 = vmatprep.subr.bf16.mxu1 %v2874_v4  ;;  %v70_v13 = vld [vmem:[#allocation5 + $0x38] sm:$0xff]  ;;  %v2880_v16 = vpack.c.bf16 %v83_v11, %v77_v10  ;;  %v63_v18 = vld [vmem:[#allocation5] sm:$0xff]  ;;  %s3274_s5 = scalar_lea.vmem %s2453_s30, 512  ;;  %p3279_p11 = scmp.lt.s32.totalorder %s2453_s30, %s2453_s30 }
  0x3b   :  { %v90_v14 = vld [vmem:[#allocation5 + $0xd8] sm:$0xff]  ;;  %v96_v15 = vld [vmem:[#allocation5 + $0x108] sm:$0xff]  ;;  %2877 = vmatpush1.bf16.msra.mxu1 %v2876_v8  ;;  %v2842_v17 = vpack.c.bf16 %v70_v13, %v64_v12  ;;  %v69_v19 = vld [vmem:[#allocation5 + $0x30] sm:$0xff]  ;;  %p3275_p10 = scmp.ne.s32.totalorder %s2453_s30, %s3274_s5  ;;  %p3280_p12 = scmp.lt.s32.totalorder %s3274_s5, %s3274_s5 }
  0x3c   :  { %v89_v20 = vld [vmem:[#allocation5 + $0xd0] sm:$0xff]  ;;  %2879 = vmatprep.subr.bf16.mxu1 %v2878_v9  ;;  %v2882_v21 = vpack.c.bf16 %v96_v15, %v90_v14  ;;  %v2844_v22 = vpack.c.bf16 %v69_v19, %v63_v18  ;;  %v95_v23 = vld [vmem:[#allocation5 + $0x100] sm:$0xff]  ;;  %v76_v24 = vld [vmem:[#allocation5 + $0x68] sm:$0xff] }
  0x3d   :  { %v82_v25 = vld [vmem:[#allocation5 + $0x98] sm:$0xff]  ;;  %2843 = vmatprep.subr.bf16.mxu0 %v2842_v17  ;;  %v108_v28 = vld [vmem:[#allocation5 + $0x168] sm:$0xff]  ;;  %v75_v29 = vld [vmem:[#allocation5 + $0x60] sm:$0xff]  ;;  %v2884_v31 = vpack.c.bf16 %v95_v23, %v89_v20  ;;  %p3281_p13 = por %p3280_p12, %p3279_p11 }
  0x3e   :  { %v2846_v26 = vpack.c.bf16 %v82_v25, %v76_v24  ;;  %v102_v27 = vld [vmem:[#allocation5 + $0x138] sm:$0xff]  ;;  %2845 = vmatpush1.bf16.msra.mxu0 %v2844_v22  ;;  %v81_v30 = vld [vmem:[#allocation5 + $0x90] sm:$0xff]  ;;  %v88_v34 = vld [vmem:[#allocation5 + $0xc8] sm:$0xff] }
  0x3f   :  { %2881 = vmatpush1.bf16.msra.mxu1 %v2880_v16  ;;  %v2848_v32 = vpack.c.bf16 %v81_v30, %v75_v29  ;;  %v101_v33 = vld [vmem:[#allocation5 + $0x130] sm:$0xff]  ;;  %v94_v35 = vld [vmem:[#allocation5 + $0xf8] sm:$0xff]  ;;  %v2886_v36 = vpack.c.bf16 %v108_v28, %v102_v27  ;;  %v107_v37 = vld [vmem:[#allocation5 + $0x160] sm:$0xff]  ;;  %p3282_p0 = pnand %p3281_p13, %p3275_p10 }
  0x40   :  { %2847 = vmatprep.subr.bf16.mxu0 %v2846_v26  ;;  %2883 = vmatprep.subr.bf16.mxu1 %v2882_v21  ;;  %v2850_v38 = vpack.c.bf16 %v94_v35, %v88_v34  ;;  %v87_v39 = vld [vmem:[#allocation5 + $0xc0] sm:$0xff]  ;;  %v93_v40 = vld [vmem:[#allocation5 + $0xf0] sm:$0xff]  ;;  %v114_v41 = vld [vmem:[#allocation5 + $0x198] sm:$0xff]  ;;  %v2888_v46 = vpack.c.bf16 %v107_v37, %v101_v33 }
  0x41   :  { %v120_v42 = vld [vmem:[#allocation5 + $0x1c8] sm:$0xff]  ;;  %v2852_v44 = vpack.c.bf16 %v93_v40, %v87_v39  ;;  %v106_v45 = vld [vmem:[#allocation5 + $0x158] sm:$0xff]  ;;  %v113_v47 = vld [vmem:[#allocation5 + $0x190] sm:$0xff] }
  0x42   :  { %v100_v43 = vld [vmem:[#allocation5 + $0x128] sm:$0xff]  ;;  %2849 = vmatpush1.bf16.msra.mxu0 %v2848_v32  ;;  %v99_v49 = vld [vmem:[#allocation5 + $0x120] sm:$0xff]  ;;  %v105_v50 = vld [vmem:[#allocation5 + $0x150] sm:$0xff]  ;;  %v2890_v51 = vpack.c.bf16 %v120_v42, %v114_v41 }
  0x43   :  { %2885 = vmatpush1.bf16.msra.mxu1 %v2884_v31  ;;  %2851 = vmatprep.subr.bf16.mxu0 %v2850_v38  ;;  %v2854_v48 = vpack.c.bf16 %v106_v45, %v100_v43  ;;  %v119_v52 = vld [vmem:[#allocation5 + $0x1c0] sm:$0xff]  ;;  %v112_v53 = vld [vmem:[#allocation5 + $0x188] sm:$0xff]  ;;  %v118_v54 = vld [vmem:[#allocation5 + $0x1b8] sm:$0xff]  ;;  %v2856_v57 = vpack.c.bf16 %v105_v50, %v99_v49 }
  0x44   :  { %2887 = vmatprep.subr.bf16.mxu1 %v2886_v36  ;;  %v126_v55 = vld [vmem:[#allocation5 + $0x1f8] sm:$0xff]  ;;  %v132_v56 = vld [vmem:[#allocation5 + $0x228] sm:$0xff]  ;;  %v2892_v58 = vpack.c.bf16 %v119_v52, %v113_v47  ;;  %v125_v59 = vld [vmem:[#allocation5 + $0x1f0] sm:$0xff]  ;;  %v2858_v60 = vpack.c.bf16 %v118_v54, %v112_v53 }
  0x45   :  { %v111_v61 = vld [vmem:[#allocation5 + $0x180] sm:$0xff]  ;;  %v117_v62 = vld [vmem:[#allocation5 + $0x1b0] sm:$0xff]  ;;  %v2894_v63 = vpack.c.bf16 %v132_v56, %v126_v55  ;;  %v124_v2 = vld [vmem:[#allocation5 + $0x1e8] sm:$0xff] }
  0x46   :  { %2853 = vmatpush1.bf16.msra.mxu0 %v2852_v44  ;;  %v131_v1 = vld [vmem:[#allocation5 + $0x220] sm:$0xff]  ;;  %v130_v3 = vld [vmem:[#allocation5 + $0x218] sm:$0xff]  ;;  %v144_v5 = vld [vmem:[#allocation5 + $0x288] sm:$0xff]  ;;  %v2860_v6 = vpack.c.bf16 %v117_v62, %v111_v61 }
  0x47   :  { %2889 = vmatpush1.bf16.msra.mxu1 %v2888_v46  ;;  %2855 = vmatprep.subr.bf16.mxu0 %v2854_v48  ;;  %v138_v4 = vld [vmem:[#allocation5 + $0x258] sm:$0xff]  ;;  %v2896_v7 = vpack.c.bf16 %v131_v1, %v125_v59  ;;  %v137_v8 = vld [vmem:[#allocation5 + $0x250] sm:$0xff]  ;;  %v2862_v9 = vpack.c.bf16 %v130_v3, %v124_v2  ;;  %v123_v10 = vld [vmem:[#allocation5 + $0x1e0] sm:$0xff] }
  0x48   :  { %2891 = vmatprep.subr.bf16.mxu1 %v2890_v51  ;;  %v129_v11 = vld [vmem:[#allocation5 + $0x210] sm:$0xff]  ;;  %v2898_v12 = vpack.c.bf16 %v144_v5, %v138_v4  ;;  %v143_v13 = vld [vmem:[#allocation5 + $0x280] sm:$0xff]  ;;  %v136_v14 = vld [vmem:[#allocation5 + $0x248] sm:$0xff] }
  0x49   :  { %v142_v15 = vld [vmem:[#allocation5 + $0x278] sm:$0xff]  ;;  %v156_v17 = vld [vmem:[#allocation5 + $0x2e8] sm:$0xff]  ;;  %v2864_v18 = vpack.c.bf16 %v129_v11, %v123_v10  ;;  %v2900_v19 = vpack.c.bf16 %v143_v13, %v137_v8  ;;  %v149_v20 = vld [vmem:[#allocation5 + $0x2b0] sm:$0xff] }
  0x4a   :  { %2857 = vmatpush1.bf16.msra.mxu0 %v2856_v57  ;;  %v150_v16 = vld [vmem:[#allocation5 + $0x2b8] sm:$0xff]  ;;  %v2866_v21 = vpack.c.bf16 %v142_v15, %v136_v14  ;;  %v135_v22 = vld [vmem:[#allocation5 + $0x240] sm:$0xff]  ;;  %v141_v23 = vld [vmem:[#allocation5 + $0x270] sm:$0xff] }
  0x4b   :  { %2893 = vmatpush1.bf16.msra.mxu1 %v2892_v58  ;;  %2859 = vmatprep.subr.bf16.mxu0 %v2858_v60  ;;  %v2902_v24 = vpack.c.bf16 %v156_v17, %v150_v16  ;;  %v155_v25 = vld [vmem:[#allocation5 + $0x2e0] sm:$0xff]  ;;  %v148_v26 = vld [vmem:[#allocation5 + $0x2a8] sm:$0xff]  ;;  %v154_v27 = vld [vmem:[#allocation5 + $0x2d8] sm:$0xff]  ;;  %v2868_v28 = vpack.c.bf16 %v141_v23, %v135_v22 }
  0x4c   :  { %2895 = vmatprep.subr.bf16.mxu1 %v2894_v63  ;;  %v2904_v29 = vpack.c.bf16 %v155_v25, %v149_v20  ;;  %v2870_v30 = vpack.c.bf16 %v154_v27, %v148_v26  ;;  %v147_v31 = vld [vmem:[#allocation5 + $0x2a0] sm:$0xff]  ;;  %v153_v32 = vld [vmem:[#allocation5 + $0x2d0] sm:$0xff]  ;;  %v3385_v35 = vld [vmem:[#allocation2 + $0x8] sm:$0xff] }
  0x4d   :  { %v2872_v33 = vpack.c.bf16 %v153_v32, %v147_v31  ;;  %v3381_v34 = vld [vmem:[#allocation2] sm:$0xff]  ;;  %v3391_v36 = vld [vmem:[#allocation2 + $0x10] sm:$0xff]  ;;  %v3397_v37 = vld [vmem:[#allocation2 + $0x18] sm:$0xff] }
  0x4e   :  { %2861 = vmatpush1.bf16.msra.mxu0 %v2860_v6  ;;  %vm3412_vm1 = vmpackc.low %vm430_vm0, %vm430_vm0  ;;  %v68_v4 = vld [vmem:[#allocation5 + $0x28] sm:$0xff]  ;;  %v74_v5 = vld [vmem:[#allocation5 + $0x58] sm:$0xff] }
  0x4f   :  { %2897 = vmatpush1.bf16.msra.mxu1 %v2896_v7  ;;  %2863 = vmatprep.subr.bf16.mxu0 %v2862_v9  ;;  %v67_v6 = vld [vmem:[#allocation5 + $0x20] sm:$0xff]  ;;  %v2906_v7 = vpack.c.bf16 %v74_v5, %v68_v4  ;;  %v73_v8 = vld [vmem:[#allocation5 + $0x50] sm:$0xff]  ;;  %v80_v9 = vld [vmem:[#allocation5 + $0x88] sm:$0xff] }
  0x50   :  { %2899 = vmatprep.subr.bf16.mxu1 %v2898_v12  ;;  %v86_v10 = vld [vmem:[#allocation5 + $0xb8] sm:$0xff]  ;;  %v2908_v11 = vpack.c.bf16 %v73_v8, %v67_v6  ;;  %v79_v13 = vld [vmem:[#allocation5 + $0x80] sm:$0xff]  ;;  %v85_v14 = vld [vmem:[#allocation5 + $0xb0] sm:$0xff] }
  0x51   :  { %v2910_v12 = vpack.c.bf16 %v86_v10, %v80_v9  ;;  %v92_v15 = vld [vmem:[#allocation5 + $0xe8] sm:$0xff]  ;;  %v98_v16 = vld [vmem:[#allocation5 + $0x118] sm:$0xff]  ;;  %v2912_v17 = vpack.c.bf16 %v85_v14, %v79_v13  ;;  %v97_v20 = vld [vmem:[#allocation5 + $0x110] sm:$0xff] }
  0x52   :  { %2865 = vmatpush1.bf16.msra.mxu0 %v2864_v18  ;;  %v2914_v18 = vpack.c.bf16 %v98_v16, %v92_v15  ;;  %v110_v22 = vld [vmem:[#allocation5 + $0x178] sm:$0xff]  ;;  %v103_v25 = vld [vmem:[#allocation5 + $0x140] sm:$0xff]  ;;  %v109_v26 = vld [vmem:[#allocation5 + $0x170] sm:$0xff] }
  0x53   :  { %2901 = vmatpush1.bf16.msra.mxu1 %v2900_v19  ;;  %2867 = vmatprep.subr.bf16.mxu0 %v2866_v21  ;;  %v91_v19 = vld [vmem:[#allocation5 + $0xe0] sm:$0xff]  ;;  %v104_v21 = vld [vmem:[#allocation5 + $0x148] sm:$0xff]  ;;  %v121_v32 = vld [vmem:[#allocation5 + $0x1d0] sm:$0xff] }
  0x54   :  { %2903 = vmatprep.subr.bf16.mxu1 %v2902_v24  ;;  %v2916_v23 = vpack.c.bf16 %v97_v20, %v91_v19  ;;  %v2918_v24 = vpack.c.bf16 %v110_v22, %v104_v21  ;;  %v116_v27 = vld [vmem:[#allocation5 + $0x1a8] sm:$0xff]  ;;  %v115_v31 = vld [vmem:[#allocation5 + $0x1a0] sm:$0xff]  ;;  %v146_v4 = vld [vmem:[#allocation5 + $0x298] sm:$0xff] }
  0x55   :  { %v145_v8 = vld [vmem:[#allocation5 + $0x290] sm:$0xff]  ;;  %v152_v9 = vld [vmem:[#allocation5 + $0x2c8] sm:$0xff]  ;;  %v158_v10 = vld [vmem:[#allocation5 + $0x2f8] sm:$0xff] }
  0x56   :  { %2869 = vmatpush1.bf16.msra.mxu0 %v2868_v28  ;;  %v122_v28 = vld [vmem:[#allocation5 + $0x1d8] sm:$0xff]  ;;  %v151_v13 = vld [vmem:[#allocation5 + $0x2c0] sm:$0xff]  ;;  %v157_v14 = vld [vmem:[#allocation5 + $0x2f0] sm:$0xff] }
  0x57   :  { %2905 = vmatpush1.bf16.msra.mxu1 %v2904_v29  ;;  %2871 = vmatprep.subr.bf16.mxu0 %v2870_v30  ;;  %v2920_v29 = vpack.c.bf16 %v109_v26, %v103_v25  ;;  %v2922_v30 = vpack.c.bf16 %v122_v28, %v116_v27  ;;  %v2936_v15 = vpack.c.bf16 %v157_v14, %v151_v13 }
  0x5a   :  { %313 = vmatmul.mubr.f32.vlgmr.msra.gmra.mrb[0].mxu1 %v3381_v34  ;;  %2873 = vmatpush1.bf16.msra.mxu0 %v2872_v33  ;;  %v128_v33 = vld [vmem:[#allocation5 + $0x208] sm:$0xff] }
  0x5b   :  { %318 = vmatprep.mubr.f32.mxu1 %v3309_v0  ;;  %2907 = vmatprep.subr.bf16.mxu0 %v2906_v7  ;;  %v139_v7 = vld [vmem:[#allocation5 + $0x260] sm:$0xff] }
  0x5d   :  { %224 = vmatmul.mubr.f32.vlgmr.msra.gmra.mrb[0].mxu0 %v3381_v34 }
  0x5e   :  { %319 = vmatmul.mubr.f32.gmra.mrb[2].mxu1 %v3385_v35  ;;  %229 = vmatprep.mubr.f32.mxu0 %v3309_v0 }
  0x5f   :  { %324 = vmatprep.mubr.f32.mxu1 %v3309_v0  ;;  %2909 = vmatpush1.bf16.msra.mxu0 %v2908_v11  ;;  %v2932_v11 = vpack.c.bf16 %v145_v8, %v139_v7 }
  0x60   :  { %2911 = vmatprep.subr.bf16.mxu0 %v2910_v12  ;;  %v2934_v12 = vpack.c.bf16 %v158_v10, %v152_v9 }
  0x61   :  { %230 = vmatmul.mubr.f32.gmra.mrb[2].mxu0 %v3385_v35 }
  0x62   :  { %325 = vmatmul.mubr.f32.gmra.mrb[4].mxu1 %v3391_v36  ;;  %235 = vmatprep.mubr.f32.mxu0 %v3309_v0 }
  0x63   :  { %330 = vmatprep.mubr.f32.mxu1 %v3309_v0  ;;  %2913 = vmatpush1.bf16.msra.mxu0 %v2912_v17 }
  0x64   :  { %2915 = vmatprep.subr.bf16.mxu0 %v2914_v18 }
  0x65   :  { %236 = vmatmul.mubr.f32.gmra.mrb[4].mxu0 %v3391_v36 }
  0x66   :  { %331 = vmatmul.mubr.f32.gmra.mrb[6].mxu1 %v3397_v37  ;;  %241 = vmatprep.mubr.f32.mxu0 %v3309_v0 }
  0x67   :  { %2917 = vmatpush1.bf16.msra.mxu0 %v2916_v23 }
  0x68   :  { %2919 = vmatprep.subr.bf16.mxu0 %v2918_v24 }
  0x69   :  { %242 = vmatmul.mubr.f32.gmra.mrb[6].mxu0 %v3397_v37 }
  0x6a   :  { %401 = vmatprep.mubr.f32.mxu0 %v3309_v0 }
  0x6b   :  { %2921 = vmatpush1.bf16.msra.mxu0 %v2920_v29 }
  0x6c   :  { %2923 = vmatprep.subr.bf16.mxu0 %v2922_v30 }
 0x12d   :  { %v3404_v38 = vpop.f32.mrb[0].mxu1 }
 0x12e   :  { %v3406_v39 = vpop.f32.mrb[1].mxu1 }
 0x130   :  { %v225_v40 = vpop.f32.mrb[0].mxu0 }
 0x131   :  { %v3408_v41 = vpop.f32.mrb[2].mxu1  ;;  %v3416_v43 = vmul.f32 0.125, %v225_v40  ;;  %v3418_v44 = vpop.f32.mrb[1].mxu0  ;;  %v134_v40 = vld [vmem:[#allocation5 + $0x238] sm:$0xff] }
 0x132   :  { %v3104_v45 = vpack.i.bf16 %v3408_v41, %v3404_v38  ;;  %v2938_v46 = vpack.c.bf16 %v3408_v41, %v3404_v38  ;;  %v3424_v47 = vpop.f32.mrb[3].mxu1 }
 0x133   :  { %v3124_v48 = vpack.i.bf16 %v3424_v47, %v3406_v39  ;;  %v3430_v49 = vpack.c.bf16 %v3424_v47, %v3406_v39  ;;  %2646 = vmatprep.mubr.msk.f32.mxu1 %vm430_vm0, %v3416_v43  ;;  %v1816_v47 = vld [vmem:[#allocation7 + $0xb0] sm:$0xff] }
 0x134   :  { %2940 = vmatprep.subr.msk.bf16.mxu1 %vm3412_vm1, %v2938_v46  ;;  %v231_v50 = vpop.f32.mrb[2].mxu0 }
 0x135   :  { %2943 = vmatpush3.bf16.xpose.msk.msra.mxu1 %vm3412_vm1, %v2938_v46  ;;  %v3438_v51 = vpop.f32.mrb[4].mxu1  ;;  %v3440_v52 = vpop.f32.mrb[3].mxu0  ;;  %v3444_v54 = vmul.f32 0.125, %v231_v50  ;;  %v2924_v46 = vpack.c.bf16 %v121_v32, %v115_v31  ;;  %v2926_v50 = vpack.c.bf16 %v134_v40, %v128_v33 }
 0x136   :  { %v3442_v53 = vpop.f32.mrb[5].mxu1 }
 0x137   :  { %2925 = vmatpush1.bf16.msra.mxu0 %v2924_v46 }
 0x138   :  { %v237_v55 = vpop.f32.mrb[4].mxu0  ;;  %2927 = vmatprep.subr.bf16.mxu0 %v2926_v50 }
 0x139   :  { %v3446_v56 = vpop.f32.mrb[6].mxu1  ;;  %v3448_v57 = vmul.f32 0.125, %v237_v55  ;;  %v3450_v58 = vpop.f32.mrb[5].mxu0  ;;  %v127_v55 = vld [vmem:[#allocation5 + $0x200] sm:$0xff] }
 0x13a   :  { %v3109_v59 = vpack.i.bf16 %v3446_v56, %v3438_v51  ;;  %v2944_v60 = vpack.c.bf16 %v3446_v56, %v3438_v51  ;;  %v3456_v61 = vpop.f32.mrb[7].mxu1 }
 0x13b   :  { %v3129_v62 = vpack.i.bf16 %v3456_v61, %v3442_v53  ;;  %v3462_v63 = vpack.c.bf16 %v3456_v61, %v3442_v53  ;;  %v1811_v53 = vld [vmem:[#allocation7 + $0x88] sm:$0xff]  ;;  %v1812_v61 = vld [vmem:[#allocation7 + $0x90] sm:$0xff] }
 0x13c   :  { %2647 = vmatmul.mubr.msk.f32.vlgmr.msra.gmra.mrb[8].mxu1 %vm430_vm0, %v3444_v54  ;;  %2946 = vmatprep.subr.msk.bf16.mxu1 %vm3412_vm1, %v2944_v60  ;;  %v243_v1 = vpop.f32.mrb[6].mxu0 }
 0x13d   :  { %2949 = vmatpush3.bf16.xpose.msk.msra.mxu1 %vm3412_vm1, %v2944_v60  ;;  %2653 = vmatprep.mubr.msk.f32.mxu1 %vm430_vm0, %v3448_v57  ;;  %v3472_v2 = vpop.f32.mrb[7].mxu0  ;;  %v3474_v3 = vmul.f32 0.125, %v243_v1  ;;  %v133_v60 = vld [vmem:[#allocation5 + $0x230] sm:$0xff]  ;;  %v140_v1 = vld [vmem:[#allocation5 + $0x268] sm:$0xff] }
 0x13e   :  { %v2928_v5 = vpack.c.bf16 %v133_v60, %v127_v55  ;;  %v2930_v6 = vpack.c.bf16 %v146_v4, %v140_v1 }
 0x140   :  { %2929 = vmatpush1.bf16.msra.mxu0 %v2928_v5 }
 0x141   :  { %2931 = vmatprep.subr.bf16.mxu0 %v2930_v6 }
 0x144   :  { %2654 = vmatmul.mubr.msk.f32.vlgmr.msra.gmra.mrb[10].mxu1 %vm430_vm0, %v3474_v3  ;;  %2933 = vmatpush1.bf16.msra.mxu0 %v2932_v11 }
 0x145   :  { %2935 = vmatprep.subr.bf16.mxu0 %v2934_v12 }
 0x148   :  { %2937 = vmatpush1.bf16.msra.mxu0 %v2936_v15 }
 0x14b   :  { %402 = vmatmul.mubr.f32.vlgmr.msra.gmra.mrb[8].mxu0 %v3381_v34 }
 0x14c   :  { %407 = vmatprep.mubr.f32.mxu0 %v3309_v0 }
 0x14f   :  { %408 = vmatmul.mubr.f32.gmra.mrb[10].mxu0 %v3385_v35 }
 0x150   :  { %413 = vmatprep.mubr.f32.mxu0 %v3309_v0 }
 0x153   :  { %414 = vmatmul.mubr.f32.gmra.mrb[12].mxu0 %v3391_v36 }
 0x154   :  { %419 = vmatprep.mubr.f32.mxu0 %v3309_v0 }
 0x157   :  { %420 = vmatmul.mubr.f32.gmra.mrb[14].mxu0 %v3397_v37 }
 0x20f   :  { %v2648_v16 = vpop.f32.mrb[8].mxu1 }
 0x210   :  { %v509_v17 = vpop.f32.mrb[9].mxu1  ;;  %v609_v34 = vsel %vm605_vm2, %v2648_v16, -inf }
 0x211   :  { %v606_v18 = vsel %vm605_vm2, %v509_v17, -inf }
 0x212   :  { %607 = vmax.xlane.f32.xlu0 %v606_v18 }
 0x216   :  { %610 = vmax.xlane.f32.xlu0 %v609_v34 }
 0x217   :  { %v2655_v19 = vpop.f32.mrb[10].mxu1 }
 0x218   :  { %v596_v20 = vpop.f32.mrb[11].mxu1  ;;  %v615_v36 = vsel %vm605_vm2, %v2655_v19, -inf }
 0x219   :  { %v612_v35 = vsel %vm605_vm2, %v596_v20, -inf }
 0x21a   :  { %613 = vmax.xlane.f32.xlu1 %v612_v35 }
 0x21e   :  { %616 = vmax.xlane.f32.xlu1 %v615_v36  ;;  %v3493_v1 = vpop.f32.mrb[8].mxu0 }
 0x21f   :  { %v3495_v4 = vpop.f32.mrb[9].mxu0 }
 0x222   :  { %v3497_v5 = vpop.f32.mrb[10].mxu0 }
 0x223   :  { %v2950_v6 = vpack.c.bf16 %v3497_v5, %v3493_v1  ;;  %v3501_v7 = vpop.f32.mrb[11].mxu0  ;;  %v3114_v8 = vpack.i.bf16 %v3497_v5, %v3493_v1 }
 0x224   :  { %v3134_v9 = vpack.i.bf16 %v3501_v7, %v3495_v4  ;;  %v3509_v10 = vpack.c.bf16 %v3501_v7, %v3495_v4 }
 0x225   :  { %2951 = vmatprep.subr.bf16.mxu1 %v2950_v6 }
 0x226   :  { %2953 = vmatpush3.bf16.msra.mxu1 %v2950_v6  ;;  %v3511_v11 = vpop.f32.mrb[12].mxu0 }
 0x227   :  { %v3513_v12 = vpop.f32.mrb[13].mxu0 }
 0x22a   :  { %v3515_v13 = vpop.f32.mrb[14].mxu0 }
 0x22b   :  { %v3119_v14 = vpack.i.bf16 %v3515_v13, %v3511_v11  ;;  %v2954_v15 = vpack.c.bf16 %v3515_v13, %v3511_v11  ;;  %v1231_v11 = vld [vmem:[#allocation7 + $0x78] sm:$0xff] }
 0x22d   :  { %2955 = vmatprep.subr.bf16.mxu1 %v2954_v15 }
 0x29f   :  { %v608_v0 = vpop.xlane.xlu0 %607 }
 0x2a0   :  { %v618_v21 = vsub.f32 %v509_v17, %v608_v0 }
 0x2a2   :  { %v622_v37 = vmul.f32 1.442695, %v618_v21 }
 0x2a3   :  { %v611_v22 = vpop.xlane.xlu0 %610 }
 0x2a4   :  { %3144 = vpow2.f32 %v622_v37  ;;  %v619_v23 = vsub.f32 %v2648_v16, %v611_v22  ;;  %v3521_v16 = vpop.f32.mrb[15].mxu0 }
 0x2a5   :  { %v3139_v17 = vpack.i.bf16 %v3521_v16, %v3513_v12  ;;  %v3527_v18 = vpack.c.bf16 %v3521_v16, %v3513_v12  ;;  %v2330_v12 = vld [vmem:[#allocation7 + $0xf8] sm:$0xff] }
 0x2a6   :  { %v624_v24 = vmul.f32 1.442695, %v619_v23 }
 0x2a7   :  { %v614_v25 = vpop.xlane.xlu1 %613 }
 0x2a8   :  { %3146 = vpow2.f32 %v624_v24  ;;  %v620_v26 = vsub.f32 %v596_v20, %v614_v25 }
 0x2aa   :  { %v626_v27 = vmul.f32 1.442695, %v620_v26 }
 0x2ab   :  { %v617_v28 = vpop.xlane.xlu1 %616 }
 0x2ac   :  { %3148 = vpow2.f32 %v626_v27  ;;  %v621_v29 = vsub.f32 %v2655_v19, %v617_v28 }
 0x2ae   :  { %v3145_v30 = vpop.eup %3144  ;;  %v628_v31 = vmul.f32 1.442695, %v621_v29 }
 0x2af   :  { %v630_v32 = vsel %vm605_vm2, %v3145_v30, 0.0 }
 0x2b0   :  { %3150 = vpow2.f32 %v628_v31  ;;  %631 = vadd.xlane.f32.xlu0 %v630_v32 }
 0x2b2   :  { %v3147_v33 = vpop.eup %3146 }
 0x2b3   :  { %v633_v40 = vsel %vm605_vm2, %v3147_v33, 0.0 }
 0x2b4   :  { %634 = vadd.xlane.f32.xlu1 %v633_v40 }
 0x2b6   :  { %v3149_v46 = vpop.eup %3148 }
 0x2b7   :  { %v636_v50 = vsel %vm605_vm2, %v3149_v46, 0.0 }
 0x2b8   :  { %637 = vadd.xlane.f32.xlu0 %v636_v50 }
 0x2ba   :  { %v3151_v55 = vpop.eup %3150 }
 0x2bb   :  { %v639_v60 = vsel %vm605_vm2, %v3151_v55, 0.0 }
 0x2bc   :  { %640 = vadd.xlane.f32.xlu1 %v639_v60 }
 0x2cd   :  { %820 = vrot.lane.b32.xlu1 %v3416_v43, %s3310_s2 }
 0x2ce   :  { %3105 = vrot.lane.b32.xlu0 %v3104_v45, %s3310_s2 }
 0x2d1   :  { %3110 = vrot.lane.b32.xlu1 %v3109_v59, %s3310_s2 }
 0x2d2   :  { %911 = vrot.lane.b32.xlu0 %v3448_v57, %s3310_s2 }
 0x2d5   :  { %822 = vrot.lane.b32.xlu1 %v3444_v54, %s3310_s2 }
 0x2d9   :  { %913 = vrot.lane.b32.xlu1 %v3474_v3, %s3310_s2 }
 0x33d   :  { %v632_v43 = vpop.xlane.xlu0 %631 }
 0x33e   :  { %3152 = vrcp.f32 %v632_v43 }
 0x341   :  { %v635_v34 = vpop.xlane.xlu1 %634 }
 0x342   :  { %3154 = vrcp.f32 %v635_v34 }
 0x345   :  { %v638_v38 = vpop.xlane.xlu0 %637 }
 0x346   :  { %3156 = vrcp.f32 %v638_v38 }
 0x348   :  { %v3153_v41 = vpop.eup %3152 }
 0x349   :  { %v3106_v45 = vpop.permute.xlu0 %3105  ;;  %v641_v19 = vpop.xlane.xlu1 %640  ;;  %v646_v51 = vmul.f32 %v3153_v41, %v3145_v30 }
 0x34a   :  { %3158 = vrcp.f32 %v641_v19  ;;  %v3108_v56 = vunpack.i.h.bf16 %v3106_v45  ;;  %v3107_v59 = vunpack.i.l.bf16 %v3106_v45 }
 0x34b   :  { %2660 = vmatprep.mubr.msk.f32.mxu1 %vm605_vm2, %v646_v51 }
 0x34c   :  { %v3155_v57 = vpop.eup %3154  ;;  %v2958_v35 = vpack.c.bf16 %v3108_v56, %v3107_v59 }
 0x34d   :  { %v647_v54 = vmul.f32 %v3155_v57, %v3147_v33  ;;  %v821_v20 = vpop.permute.xlu1 %820  ;;  %v912_v26 = vpop.permute.xlu0 %911 }
 0x34f   :  { %2661 = vmatmul.mubr.msk.f32.vlgmr.msra.gmra.mrb[12].mxu1 %vm605_vm2, %v647_v54 }
 0x350   :  { %v3157_v3 = vpop.eup %3156  ;;  %2957 = vmatpush3.bf16.msra.mxu1 %v2954_v15 }
 0x351   :  { %2960 = vmatprep.subr.msk.bf16.mxu1 %vm3412_vm1, %v2958_v35  ;;  %v3111_v36 = vpop.permute.xlu1 %3110  ;;  %v648_v0 = vmul.f32 %v3157_v3, %v3149_v46 }
 0x352   :  { %v3113_v37 = vunpack.i.h.bf16 %v3111_v36  ;;  %v3112_v22 = vunpack.i.l.bf16 %v3111_v36 }
 0x353   :  { %2667 = vmatprep.mubr.msk.f32.mxu1 %vm605_vm2, %v648_v0 }
 0x354   :  { %v3159_v21 = vpop.eup %3158  ;;  %v2964_v24 = vpack.c.bf16 %v3113_v37, %v3112_v22 }
 0x355   :  { %v649_v23 = vmul.f32 %v3159_v21, %v3151_v55  ;;  %v823_v25 = vpop.permute.xlu1 %822 }
 0x357   :  { %2668 = vmatmul.mubr.msk.f32.vlgmr.msra.gmra.mrb[14].mxu1 %vm605_vm2, %v649_v23  ;;  %v1224_v23 = vld [vmem:[#allocation7 + $0x40] sm:$0xff] }
 0x358   :  { %2674 = vmatprep.mubr.msk.f32.mxu1 %vm430_vm0, %v821_v20 }
 0x359   :  { %2963 = vmatpush3.bf16.xpose.msk.msra.mxu1 %vm3412_vm1, %v2958_v35  ;;  %v914_v27 = vpop.permute.xlu1 %913 }
 0x35a   :  { %2966 = vmatprep.subr.msk.bf16.mxu1 %vm3412_vm1, %v2964_v24 }
 0x360   :  { %2675 = vmatmul.mubr.msk.f32.vlgmr.msra.gmra.mrb[16].mxu1 %vm430_vm0, %v823_v25  ;;  %v1226_v25 = vld [vmem:[#allocation7 + $0x50] sm:$0xff] }
 0x361   :  { %2969 = vmatpush3.bf16.xpose.msk.msra.mxu1 %vm3412_vm1, %v2964_v24  ;;  %2681 = vmatprep.mubr.msk.f32.mxu1 %vm430_vm0, %v912_v26  ;;  %v1225_v24 = vld [vmem:[#allocation7 + $0x48] sm:$0xff] }
 0x362   :  { %v2978_v26 = vpack.c.bf16 %v1225_v24, %v1224_v23  ;;  %v817_v23 = vld [vmem:[#allocation7 + $0x28] sm:$0xff] }
 0x364   :  { %2979 = vmatprep.subr.bf16.mxu0 %v2978_v26 }
 0x365   :  { %2981 = vmatpush3.bf16.msra.mxu0 %v2978_v26  ;;  %v818_v26 = vld [vmem:[#allocation7 + $0x30] sm:$0xff] }
 0x368   :  { %2682 = vmatmul.mubr.msk.f32.vlgmr.msra.gmra.mrb[18].mxu1 %vm430_vm0, %v914_v27  ;;  %v1227_v27 = vld [vmem:[#allocation7 + $0x58] sm:$0xff] }
 0x422   :  { %v3561_v28 = vpop.f32.mrb[12].mxu1 }
 0x423   :  { %v3563_v29 = vpop.f32.mrb[13].mxu1 }
 0x42a   :  { %v3565_v30 = vpop.f32.mrb[14].mxu1 }
 0x42b   :  { %v3567_v31 = vpop.f32.mrb[15].mxu1 }
 0x433   :  { %v2676_v32 = vpop.f32.mrb[16].mxu1 }
 0x434   :  { %v902_v33 = vpop.f32.mrb[17].mxu1  ;;  %v1005_v40 = vsel %vm605_vm2, %v2676_v32, -inf }
 0x435   :  { %1006 = vmax.xlane.f32.xlu1 %v1005_v40  ;;  %v1002_v46 = vsel %vm605_vm2, %v902_v33, -inf  ;;  %v1229_v40 = vld [vmem:[#allocation7 + $0x68] sm:$0xff] }
 0x436   :  { %1003 = vmax.xlane.f32.xlu0 %v1002_v46 }
 0x43b   :  { %v2683_v50 = vpop.f32.mrb[18].mxu1 }
 0x43c   :  { %v993_v55 = vpop.f32.mrb[19].mxu1  ;;  %v1011_v6 = vsel %vm605_vm2, %v2683_v50, -inf }
 0x43d   :  { %v1008_v60 = vsel %vm605_vm2, %v993_v55, -inf }
 0x43e   :  { %1009 = vmax.xlane.f32.xlu0 %v1008_v60 }
 0x442   :  { %1012 = vmax.xlane.f32.xlu0 %v1011_v6 }
 0x4c2   :  { %v1007_v15 = vpop.xlane.xlu1 %1006 }
 0x4c3   :  { %v1015_v43 = vsub.f32 %v2676_v32, %v1007_v15  ;;  %v1004_v34 = vpop.xlane.xlu0 %1003  ;;  %v2982_v32 = vpack.c.bf16 %v1227_v27, %v1226_v25  ;;  %v819_v27 = vld [vmem:[#allocation7 + $0x38] sm:$0xff] }
 0x4c4   :  { %v1014_v38 = vsub.f32 %v902_v33, %v1004_v34  ;;  %v1228_v33 = vld [vmem:[#allocation7 + $0x60] sm:$0xff] }
 0x4c5   :  { %v1020_v41 = vmul.f32 1.442695, %v1015_v43  ;;  %2983 = vmatprep.subr.bf16.mxu0 %v2982_v32  ;;  %v2986_v46 = vpack.c.bf16 %v1229_v40, %v1228_v33 }
 0x4c6   :  { %v1018_v45 = vmul.f32 1.442695, %v1014_v38  ;;  %2985 = vmatpush3.bf16.msra.mxu0 %v2982_v32  ;;  %v3006_v32 = vpack.c.bf16 %v819_v27, %v818_v26 }
 0x4c7   :  { %3160 = vpow2.f32 %v1020_v41  ;;  %2987 = vmatprep.subr.bf16.mxu0 %v2986_v46 }
 0x4c8   :  { %3162 = vpow2.f32 %v1018_v45 }
 0x4ca   :  { %2989 = vmatpush3.bf16.msra.mxu0 %v2986_v46 }
 0x4cb   :  { %v1010_v19 = vpop.xlane.xlu0 %1009 }
 0x4cc   :  { %v1016_v51 = vsub.f32 %v993_v55, %v1010_v19 }
 0x4ce   :  { %v1022_v56 = vmul.f32 1.442695, %v1016_v51 }
 0x4cf   :  { %v1013_v59 = vpop.xlane.xlu0 %1012 }
 0x4d0   :  { %3164 = vpow2.f32 %v1022_v56  ;;  %v1017_v57 = vsub.f32 %v2683_v50, %v1013_v59  ;;  %v1230_v50 = vld [vmem:[#allocation7 + $0x70] sm:$0xff] }
 0x4d1   :  { %v3161_v54 = vpop.eup %3160  ;;  %v2990_v13 = vpack.c.bf16 %v1231_v11, %v1230_v50 }
 0x4d2   :  { %v3163_v20 = vpop.eup %3162  ;;  %v1024_v35 = vmul.f32 1.442695, %v1017_v57  ;;  %v1029_v3 = vsel %vm605_vm2, %v3161_v54, 0.0 }
 0x4d3   :  { %1030 = vadd.xlane.f32.xlu1 %v1029_v3  ;;  %v1026_v36 = vsel %vm605_vm2, %v3163_v20, 0.0  ;;  %2991 = vmatprep.subr.bf16.mxu0 %v2990_v13  ;;  %v3592_v3 = vmul.f32 0.125, %v3418_v44  ;;  %v3618_v44 = vmul.f32 0.125, %v3472_v2  ;;  %v816_v2 = vld [vmem:[#allocation7 + $0x20] sm:$0xff] }
 0x4d4   :  { %3166 = vpow2.f32 %v1024_v35  ;;  %1027 = vadd.xlane.f32.xlu0 %v1026_v36  ;;  %2993 = vmatpush3.bf16.msra.mxu0 %v2990_v13  ;;  %v3607_v36 = vmul.f32 0.125, %v3450_v58 }
 0x4da   :  { %v3165_v0 = vpop.eup %3164 }
 0x4db   :  { %v1032_v21 = vsel %vm605_vm2, %v3165_v0, 0.0 }
 0x4dc   :  { %1033 = vadd.xlane.f32.xlu0 %v1032_v21 }
 0x4de   :  { %v3167_v37 = vpop.eup %3166 }
 0x4df   :  { %v1035_v22 = vsel %vm605_vm2, %v3167_v37, 0.0 }
 0x4e0   :  { %1036 = vadd.xlane.f32.xlu1 %v1035_v22 }
 0x4f1   :  { %3120 = vrot.lane.b32.xlu1 %v3119_v14, %s3310_s2 }
 0x4f2   :  { %3115 = vrot.lane.b32.xlu0 %v3114_v8, %s3310_s2 }
 0x560   :  { %v1031_v5 = vpop.xlane.xlu1 %1030 }
 0x561   :  { %v1028_v1 = vpop.xlane.xlu0 %1027 }
 0x562   :  { %3168 = vrcp.f32 %v1028_v1 }
 0x563   :  { %3170 = vrcp.f32 %v1031_v5 }
 0x569   :  { %v1034_v8 = vpop.xlane.xlu0 %1033 }
 0x56a   :  { %3172 = vrcp.f32 %v1034_v8 }
 0x56c   :  { %v3169_v14 = vpop.eup %3168 }
 0x56d   :  { %v1037_v55 = vpop.xlane.xlu1 %1036  ;;  %v3116_v60 = vpop.permute.xlu0 %3115  ;;  %v1042_v6 = vmul.f32 %v3169_v14, %v3163_v20 }
 0x56e   :  { %3174 = vrcp.f32 %v1037_v55  ;;  %v3118_v15 = vunpack.i.h.bf16 %v3116_v60  ;;  %v3117_v43 = vunpack.i.l.bf16 %v3116_v60  ;;  %v3171_v38 = vpop.eup %3170 }
 0x56f   :  { %2688 = vmatprep.mubr.msk.f32.mxu1 %vm605_vm2, %v1042_v6  ;;  %v1043_v56 = vmul.f32 %v3171_v38, %v3161_v54  ;;  %v3604_v54 = vmul.f32 0.125, %v3440_v52  ;;  %v813_v52 = vld [vmem:[#allocation7 + $0x8] sm:$0xff] }
 0x570   :  { %v2970_v34 = vpack.c.bf16 %v3118_v15, %v3117_v43 }
 0x571   :  { %v3121_v41 = vpop.permute.xlu1 %3120 }
 0x572   :  { %v3123_v45 = vunpack.i.h.bf16 %v3121_v41  ;;  %v3122_v19 = vunpack.i.l.bf16 %v3121_v41  ;;  %2971 = vmatprep.subr.bf16.mxu1 %v2970_v34 }
 0x573   :  { %2973 = vmatpush3.bf16.msra.mxu1 %v2970_v34 }
 0x574   :  { %v3173_v51 = vpop.eup %3172  ;;  %v2974_v59 = vpack.c.bf16 %v3123_v45, %v3122_v19 }
 0x575   :  { %v1044_v57 = vmul.f32 %v3173_v51, %v3165_v0  ;;  %v815_v0 = vld [vmem:[#allocation7 + $0x18] sm:$0xff] }
 0x576   :  { %2689 = vmatmul.mubr.msk.f32.vlgmr.msra.gmra.mrb[20].mxu1 %vm605_vm2, %v1043_v56  ;;  %2975 = vmatprep.subr.bf16.mxu1 %v2974_v59 }
 0x577   :  { %2977 = vmatpush3.bf16.msra.mxu1 %v2974_v59  ;;  %2695 = vmatprep.mubr.msk.f32.mxu1 %vm605_vm2, %v1044_v57 }
 0x578   :  { %v3175_v20 = vpop.eup %3174  ;;  %3012 = vmatprep.subr.msk.bf16.mxu1 %vm3412_vm1, %v3430_v49 }
 0x579   :  { %v1045_v35 = vmul.f32 %v3175_v20, %v3167_v37  ;;  %v1810_v20 = vld [vmem:[#allocation7 + $0x80] sm:$0xff] }
 0x57b   :  { %2696 = vmatmul.mubr.msk.f32.vlgmr.msra.gmra.mrb[22].mxu1 %vm605_vm2, %v1045_v35  ;;  %v1813_v35 = vld [vmem:[#allocation7 + $0x98] sm:$0xff] }
 0x57c   :  { %2746 = vmatprep.mubr.msk.f32.mxu1 %vm430_vm0, %v3592_v3 }
 0x580   :  { %3015 = vmatpush3.bf16.xpose.msk.msra.mxu1 %vm3412_vm1, %v3430_v49  ;;  %v812_v49 = vld [vmem:[#allocation7] sm:$0xff] }
 0x581   :  { %3018 = vmatprep.subr.msk.bf16.mxu1 %vm3412_vm1, %v3462_v63  ;;  %v2994_v58 = vpack.c.bf16 %v813_v52, %v812_v49  ;;  %v1814_v49 = vld [vmem:[#allocation7 + $0xa0] sm:$0xff]  ;;  %v1815_v52 = vld [vmem:[#allocation7 + $0xa8] sm:$0xff] }
 0x582   :  { %v3038_v39 = vpack.c.bf16 %v1815_v52, %v1814_v49 }
 0x583   :  { %2995 = vmatprep.subr.bf16.mxu0 %v2994_v58 }
 0x587   :  { %2747 = vmatmul.mubr.msk.f32.vlgmr.msra.gmra.mrb[24].mxu1 %vm430_vm0, %v3604_v54 }
 0x588   :  { %3021 = vmatpush3.bf16.xpose.msk.msra.mxu1 %vm3412_vm1, %v3462_v63  ;;  %2753 = vmatprep.mubr.msk.f32.mxu1 %vm430_vm0, %v3607_v36  ;;  %v814_v63 = vld [vmem:[#allocation7 + $0x10] sm:$0xff] }
 0x589   :  { %3023 = vmatprep.subr.bf16.mxu1 %v3509_v10  ;;  %v2998_v22 = vpack.c.bf16 %v815_v0, %v814_v63 }
 0x58f   :  { %2754 = vmatmul.mubr.msk.f32.vlgmr.msra.gmra.mrb[26].mxu1 %vm430_vm0, %v3618_v44 }
 0x590   :  { %3025 = vmatpush3.bf16.msra.mxu1 %v3509_v10  ;;  %v3002_v10 = vpack.c.bf16 %v817_v23, %v816_v2 }
 0x591   :  { %3027 = vmatprep.subr.bf16.mxu1 %v3527_v18 }
 0x649   :  { %v2690_v21 = vpop.f32.mrb[20].mxu1 }
 0x64a   :  { %v1126_v37 = vpop.f32.mrb[21].mxu1 }
 0x64b   :  { %2714 = vmatprep.mubr.msk.f32.mxu0 %vm430_vm0, %v1126_v37 }
 0x64c   :  { %2715 = vmatmul.mubr.msk.f32.vlgmr.msra.gmra.mrb[16].mxu0 %vm430_vm0, %v2690_v21 }
 0x64d   :  { %2997 = vmatpush3.bf16.msra.mxu0 %v2994_v58 }
 0x64e   :  { %v2697_v24 = vpop.f32.mrb[22].mxu1  ;;  %2999 = vmatprep.subr.bf16.mxu0 %v2998_v22 }
 0x64f   :  { %v1215_v25 = vpop.f32.mrb[23].mxu1 }
 0x650   :  { %2717 = vmatprep.mubr.msk.f32.mxu0 %vm430_vm0, %v1215_v25 }
 0x651   :  { %3001 = vmatpush3.bf16.msra.mxu0 %v2998_v22 }
 0x652   :  { %2718 = vmatmul.mubr.msk.f32.gmra.mrb[18].mxu0 %vm430_vm0, %v2697_v24  ;;  %3003 = vmatprep.subr.bf16.mxu0 %v3002_v10 }
 0x653   :  { %2736 = vmatprep.mubr.msk.f32.mxu0 %vm430_vm0, %v3563_v29 }
 0x655   :  { %3005 = vmatpush3.bf16.msra.mxu0 %v3002_v10 }
 0x656   :  { %3007 = vmatprep.subr.bf16.mxu0 %v3006_v32 }
 0x659   :  { %3009 = vmatpush3.bf16.msra.mxu0 %v3006_v32 }
 0x65a   :  { %v2748_v33 = vpop.f32.mrb[24].mxu1 }
 0x65b   :  { %v1508_v40 = vpop.f32.mrb[25].mxu1  ;;  %v1607_v46 = vsel %vm605_vm2, %v2748_v33, -inf }
 0x65c   :  { %2737 = vmatmul.mubr.msk.f32.vlgmr.msra.gmra.mrb[16].mxu0 %vm430_vm0, %v3561_v28  ;;  %1608 = vmax.xlane.f32.xlu0 %v1607_v46  ;;  %v1604_v50 = vsel %vm605_vm2, %v1508_v40, -inf }
 0x65d   :  { %2739 = vmatprep.mubr.msk.f32.mxu0 %vm430_vm0, %v3567_v31  ;;  %1605 = vmax.xlane.f32.xlu1 %v1604_v50 }
 0x660   :  { %2740 = vmatmul.mubr.msk.f32.gmra.mrb[18].mxu0 %vm430_vm0, %v3565_v30 }
 0x662   :  { %v2755_v29 = vpop.f32.mrb[26].mxu1 }
 0x663   :  { %v1595_v11 = vpop.f32.mrb[27].mxu1  ;;  %v1613_v13 = vsel %vm605_vm2, %v2755_v29, -inf }
 0x664   :  { %1614 = vmax.xlane.f32.xlu1 %v1613_v13  ;;  %v1610_v1 = vsel %vm605_vm2, %v1595_v11, -inf }
 0x665   :  { %1611 = vmax.xlane.f32.xlu0 %v1610_v1 }
 0x6e9   :  { %v1609_v5 = vpop.xlane.xlu0 %1608 }
 0x6ea   :  { %v1617_v28 = vsub.f32 %v2748_v33, %v1609_v5  ;;  %v1606_v8 = vpop.xlane.xlu1 %1605 }
 0x6eb   :  { %v1616_v14 = vsub.f32 %v1508_v40, %v1606_v8 }
 0x6ec   :  { %v1622_v55 = vmul.f32 1.442695, %v1617_v28 }
 0x6ed   :  { %v1620_v60 = vmul.f32 1.442695, %v1616_v14 }
 0x6ee   :  { %3176 = vpow2.f32 %v1622_v55 }
 0x6ef   :  { %3178 = vpow2.f32 %v1620_v60 }
 0x6f1   :  { %v1615_v31 = vpop.xlane.xlu1 %1614 }
 0x6f2   :  { %v1619_v6 = vsub.f32 %v2755_v29, %v1615_v31  ;;  %v1612_v15 = vpop.xlane.xlu0 %1611 }
 0x6f3   :  { %v1618_v30 = vsub.f32 %v1595_v11, %v1612_v15 }
 0x6f4   :  { %v1626_v43 = vmul.f32 1.442695, %v1619_v6 }
 0x6f5   :  { %v1624_v34 = vmul.f32 1.442695, %v1618_v30 }
 0x6f6   :  { %3180 = vpow2.f32 %v1626_v43 }
 0x6f7   :  { %3182 = vpow2.f32 %v1624_v34 }
 0x6f8   :  { %v3177_v38 = vpop.eup %3176 }
 0x6f9   :  { %v3179_v41 = vpop.eup %3178  ;;  %v1631_v45 = vsel %vm605_vm2, %v3177_v38, 0.0 }
 0x6fa   :  { %1632 = vadd.xlane.f32.xlu1 %v1631_v45  ;;  %v1628_v19 = vsel %vm605_vm2, %v3179_v41, 0.0 }
 0x6fb   :  { %1629 = vadd.xlane.f32.xlu0 %v1628_v19 }
 0x700   :  { %v3181_v51 = vpop.eup %3180 }
 0x701   :  { %v3183_v56 = vpop.eup %3182  ;;  %v1637_v59 = vsel %vm605_vm2, %v3181_v51, 0.0 }
 0x702   :  { %1638 = vadd.xlane.f32.xlu1 %v1637_v59  ;;  %v1634_v57 = vsel %vm605_vm2, %v3183_v56, 0.0 }
 0x703   :  { %1635 = vadd.xlane.f32.xlu0 %v1634_v57 }
 0x713   :  { %3130 = vrot.lane.b32.xlu1 %v3129_v62, %s3310_s2  ;;  %v3030_v62 = vpack.c.bf16 %v1811_v53, %v1810_v20 }
 0x715   :  { %3031 = vmatprep.subr.bf16.mxu0 %v3030_v62 }
 0x716   :  { %3033 = vmatpush3.bf16.msra.mxu0 %v3030_v62 }
 0x717   :  { %1919 = vrot.lane.b32.xlu1 %v3592_v3, %s3310_s2  ;;  %v3034_v3 = vpack.c.bf16 %v1813_v35, %v1812_v61 }
 0x719   :  { %3125 = vrot.lane.b32.xlu0 %v3124_v48, %s3310_s2  ;;  %3035 = vmatprep.subr.bf16.mxu0 %v3034_v3  ;;  %v1817_v48 = vld [vmem:[#allocation7 + $0xb8] sm:$0xff] }
 0x71a   :  { %3037 = vmatpush3.bf16.msra.mxu0 %v3034_v3 }
 0x71b   :  { %1921 = vrot.lane.b32.xlu1 %v3604_v54, %s3310_s2  ;;  %3039 = vmatprep.subr.bf16.mxu0 %v3038_v39  ;;  %v3042_v54 = vpack.c.bf16 %v1817_v48, %v1816_v47  ;;  %v2323_v48 = vld [vmem:[#allocation7 + $0xc0] sm:$0xff] }
 0x71d   :  { %2010 = vrot.lane.b32.xlu0 %v3607_v36, %s3310_s2 }
 0x71e   :  { %3041 = vmatpush3.bf16.msra.mxu0 %v3038_v39 }
 0x71f   :  { %2012 = vrot.lane.b32.xlu1 %v3618_v44, %s3310_s2  ;;  %3043 = vmatprep.subr.bf16.mxu0 %v3042_v54 }
 0x722   :  { %3045 = vmatpush3.bf16.msra.mxu0 %v3042_v54  ;;  %v2324_v54 = vld [vmem:[#allocation7 + $0xc8] sm:$0xff] }
 0x787   :  { %v1633_v36 = vpop.xlane.xlu1 %1632 }
 0x788   :  { %3184 = vrcp.f32 %v1633_v36  ;;  %v1630_v44 = vpop.xlane.xlu0 %1629  ;;  %v2325_v36 = vld [vmem:[#allocation7 + $0xd0] sm:$0xff] }
 0x789   :  { %3186 = vrcp.f32 %v1630_v44  ;;  %v3066_v44 = vpack.c.bf16 %v2324_v54, %v2323_v48 }
 0x78b   :  { %3067 = vmatprep.subr.bf16.mxu0 %v3066_v44 }
 0x78f   :  { %v1639_v58 = vpop.xlane.xlu1 %1638 }
 0x790   :  { %3188 = vrcp.f32 %v1639_v58  ;;  %v1636_v63 = vpop.xlane.xlu0 %1635  ;;  %v2326_v58 = vld [vmem:[#allocation7 + $0xd8] sm:$0xff] }
 0x791   :  { %3190 = vrcp.f32 %v1636_v63  ;;  %v3070_v63 = vpack.c.bf16 %v2326_v58, %v2325_v36 }
 0x792   :  { %v3185_v0 = vpop.eup %3184 }
 0x793   :  { %v3187_v21 = vpop.eup %3186  ;;  %v1645_v2 = vmul.f32 %v3185_v0, %v3177_v38  ;;  %v3131_v25 = vpop.permute.xlu1 %3130  ;;  %v2327_v0 = vld [vmem:[#allocation7 + $0xe0] sm:$0xff] }
 0x794   :  { %v3126_v37 = vpop.permute.xlu0 %3125  ;;  %v1644_v22 = vmul.f32 %v3187_v21, %v3179_v41  ;;  %v3133_v32 = vunpack.i.h.bf16 %v3131_v25  ;;  %v3132_v33 = vunpack.i.l.bf16 %v3131_v25  ;;  %v2328_v21 = vld [vmem:[#allocation7 + $0xe8] sm:$0xff] }
 0x795   :  { %v3128_v23 = vunpack.i.h.bf16 %v3126_v37  ;;  %v3127_v24 = vunpack.i.l.bf16 %v3126_v37  ;;  %v3074_v37 = vpack.c.bf16 %v2328_v21, %v2327_v0 }
 0x796   :  { %2760 = vmatprep.mubr.msk.f32.mxu1 %vm605_vm2, %v1644_v22  ;;  %v3052_v29 = vpack.c.bf16 %v3133_v32, %v3132_v33  ;;  %v2329_v22 = vld [vmem:[#allocation7 + $0xf0] sm:$0xff] }
 0x797   :  { %v3046_v10 = vpack.c.bf16 %v3128_v23, %v3127_v24  ;;  %2761 = vmatmul.mubr.msk.f32.vlgmr.msra.gmra.mrb[28].mxu1 %vm605_vm2, %v1645_v2  ;;  %v1920_v50 = vpop.permute.xlu1 %1919  ;;  %v3078_v16 = vpack.c.bf16 %v2330_v12, %v2329_v22 }
 0x798   :  { %3029 = vmatpush3.bf16.msra.mxu1 %v3527_v18  ;;  %v2011_v11 = vpop.permute.xlu0 %2010 }
 0x799   :  { %3048 = vmatprep.subr.msk.bf16.mxu1 %vm3412_vm1, %v3046_v10 }
 0x79a   :  { %v3189_v26 = vpop.eup %3188 }
 0x79b   :  { %v3191_v27 = vpop.eup %3190  ;;  %v1647_v46 = vmul.f32 %v3189_v26, %v3181_v51  ;;  %v1922_v18 = vpop.permute.xlu1 %1921 }
 0x79c   :  { %v1646_v40 = vmul.f32 %v3191_v27, %v3183_v56 }
 0x79e   :  { %2767 = vmatprep.mubr.msk.f32.mxu1 %vm605_vm2, %v1646_v40 }
 0x79f   :  { %2768 = vmatmul.mubr.msk.f32.vlgmr.msra.gmra.mrb[30].mxu1 %vm605_vm2, %v1647_v46  ;;  %v2013_v13 = vpop.permute.xlu1 %2012 }
 0x7a0   :  { %2796 = vmatprep.mubr.msk.f32.mxu1 %vm430_vm0, %v1920_v50 }
 0x7a1   :  { %3051 = vmatpush3.bf16.xpose.msk.msra.mxu1 %vm3412_vm1, %v3046_v10 }
 0x7a2   :  { %3054 = vmatprep.subr.msk.bf16.mxu1 %vm3412_vm1, %v3052_v29 }
 0x7a8   :  { %2797 = vmatmul.mubr.msk.f32.vlgmr.msra.gmra.mrb[32].mxu1 %vm430_vm0, %v1922_v18 }
 0x7a9   :  { %3057 = vmatpush3.bf16.xpose.msk.msra.mxu1 %vm3412_vm1, %v3052_v29  ;;  %2803 = vmatprep.mubr.msk.f32.mxu1 %vm430_vm0, %v2011_v11 }
 0x7b0   :  { %2804 = vmatmul.mubr.msk.f32.vlgmr.msra.gmra.mrb[34].mxu1 %vm430_vm0, %v2013_v13 }
 0x86a   :  { %v2762_v1 = vpop.f32.mrb[28].mxu1 }
 0x86b   :  { %v1720_v5 = vpop.f32.mrb[29].mxu1 }
 0x86c   :  { %2786 = vmatprep.mubr.msk.f32.mxu0 %vm430_vm0, %v1720_v5 }
 0x86d   :  { %2787 = vmatmul.mubr.msk.f32.vlgmr.msra.gmra.mrb[16].mxu0 %vm430_vm0, %v2762_v1 }
 0x86e   :  { %3069 = vmatpush3.bf16.msra.mxu0 %v3066_v44 }
 0x86f   :  { %3071 = vmatprep.subr.bf16.mxu0 %v3070_v63 }
 0x872   :  { %v2769_v28 = vpop.f32.mrb[30].mxu1  ;;  %3073 = vmatpush3.bf16.msra.mxu0 %v3070_v63 }
 0x873   :  { %v1801_v8 = vpop.f32.mrb[31].mxu1  ;;  %3075 = vmatprep.subr.bf16.mxu0 %v3074_v37 }
 0x874   :  { %2789 = vmatprep.mubr.msk.f32.mxu0 %vm430_vm0, %v1801_v8 }
 0x875   :  { %2790 = vmatmul.mubr.msk.f32.gmra.mrb[18].mxu0 %vm430_vm0, %v2769_v28 }
 0x876   :  { %3077 = vmatpush3.bf16.msra.mxu0 %v3074_v37 }
 0x877   :  { %3079 = vmatprep.subr.bf16.mxu0 %v3078_v16 }
 0x87a   :  { %3081 = vmatpush3.bf16.msra.mxu0 %v3078_v16 }
 0x87b   :  { %v2798_v14 = vpop.f32.mrb[32].mxu1 }
 0x87c   :  { %v2001_v42 = vpop.f32.mrb[33].mxu1  ;;  %v2104_v55 = vsel %vm605_vm2, %v2798_v14, -inf }
 0x87d   :  { %2105 = vmax.xlane.f32.xlu1 %v2104_v55  ;;  %v2101_v60 = vsel %vm605_vm2, %v2001_v42, -inf }
 0x87e   :  { %2102 = vmax.xlane.f32.xlu0 %v2101_v60 }
 0x883   :  { %v2805_v31 = vpop.f32.mrb[34].mxu1 }
 0x884   :  { %v2092_v6 = vpop.f32.mrb[35].mxu1  ;;  %v2110_v30 = vsel %vm605_vm2, %v2805_v31, -inf }
 0x885   :  { %v2107_v15 = vsel %vm605_vm2, %v2092_v6, -inf }
 0x886   :  { %2108 = vmax.xlane.f32.xlu0 %v2107_v15 }
 0x88a   :  { %2111 = vmax.xlane.f32.xlu0 %v2110_v30 }
 0x90a   :  { %v2106_v43 = vpop.xlane.xlu1 %2105 }
 0x90b   :  { %v2114_v34 = vsub.f32 %v2798_v14, %v2106_v43  ;;  %v2103_v38 = vpop.xlane.xlu0 %2102  ;;  %v2529_v14 = vld [vmem:[%s3726_s3] ss:$0 sm:$0xff] }
 0x90c   :  { %v2113_v41 = vsub.f32 %v2001_v42, %v2103_v38 }
 0x90d   :  { %v2119_v45 = vmul.f32 1.442695, %v2114_v34 }
 0x90e   :  { %v2117_v19 = vmul.f32 1.442695, %v2113_v41 }
 0x90f   :  { %3192 = vpow2.f32 %v2119_v45 }
 0x910   :  { %3194 = vpow2.f32 %v2117_v19 }
 0x913   :  { %v2109_v51 = vpop.xlane.xlu0 %2108 }
 0x914   :  { %v2115_v56 = vsub.f32 %v2092_v6, %v2109_v51 }
 0x916   :  { %v2121_v59 = vmul.f32 1.442695, %v2115_v56 }
 0x917   :  { %v2112_v57 = vpop.xlane.xlu0 %2111 }
 0x918   :  { %3196 = vpow2.f32 %v2121_v59  ;;  %v2116_v20 = vsub.f32 %v2805_v31, %v2112_v57 }
 0x919   :  { %v3193_v53 = vpop.eup %3192 }
 0x91a   :  { %v3195_v61 = vpop.eup %3194  ;;  %v2123_v62 = vmul.f32 1.442695, %v2116_v20  ;;  %v2128_v35 = vsel %vm605_vm2, %v3193_v53, 0.0 }
 0x91b   :  { %2129 = vadd.xlane.f32.xlu1 %v2128_v35  ;;  %v2125_v3 = vsel %vm605_vm2, %v3195_v61, 0.0 }
 0x91c   :  { %3198 = vpow2.f32 %v2123_v62  ;;  %2126 = vadd.xlane.f32.xlu0 %v2125_v3 }
 0x922   :  { %v3197_v49 = vpop.eup %3196 }
 0x923   :  { %v2131_v52 = vsel %vm605_vm2, %v3197_v49, 0.0 }
 0x924   :  { %2132 = vadd.xlane.f32.xlu0 %v2131_v52 }
 0x926   :  { %v3199_v39 = vpop.eup %3198 }
 0x927   :  { %v2134_v47 = vsel %vm605_vm2, %v3199_v39, 0.0 }
 0x928   :  { %2135 = vadd.xlane.f32.xlu1 %v2134_v47 }
 0x939   :  { %3140 = vrot.lane.b32.xlu1 %v3139_v17, %s3310_s2 }
 0x93a   :  { %3135 = vrot.lane.b32.xlu0 %v3134_v9, %s3310_s2 }
 0x9a8   :  { %v2130_v7 = vpop.xlane.xlu1 %2129 }
 0x9a9   :  { %v2127_v4 = vpop.xlane.xlu0 %2126 }
 0x9aa   :  { %3200 = vrcp.f32 %v2127_v4 }
 0x9ab   :  { %3202 = vrcp.f32 %v2130_v7 }
 0x9b1   :  { %v2133_v9 = vpop.xlane.xlu0 %2132 }
 0x9b2   :  { %3204 = vrcp.f32 %v2133_v9 }
 0x9b4   :  { %v3201_v17 = vpop.eup %3200 }
 0x9b5   :  { %v2136_v2 = vpop.xlane.xlu1 %2135  ;;  %v3136_v23 = vpop.permute.xlu0 %3135  ;;  %v2141_v24 = vmul.f32 %v3201_v17, %v3195_v61 }
 0x9b6   :  { %3206 = vrcp.f32 %v2136_v2  ;;  %v3138_v10 = vunpack.i.h.bf16 %v3136_v23  ;;  %v3137_v25 = vunpack.i.l.bf16 %v3136_v23  ;;  %v3203_v27 = vpop.eup %3202 }
 0x9b7   :  { %2810 = vmatprep.mubr.msk.f32.mxu1 %vm605_vm2, %v2141_v24  ;;  %v2142_v50 = vmul.f32 %v3203_v27, %v3193_v53 }
 0x9b8   :  { %v3058_v26 = vpack.c.bf16 %v3138_v10, %v3137_v25 }
 0x9b9   :  { %v3141_v32 = vpop.permute.xlu1 %3140 }
 0x9ba   :  { %v3143_v33 = vunpack.i.h.bf16 %v3141_v32  ;;  %v3142_v40 = vunpack.i.l.bf16 %v3141_v32  ;;  %3059 = vmatprep.subr.bf16.mxu1 %v3058_v26 }
 0x9bb   :  { %3061 = vmatpush3.bf16.msra.mxu1 %v3058_v26 }
 0x9bc   :  { %v3205_v46 = vpop.eup %3204  ;;  %v3062_v29 = vpack.c.bf16 %v3143_v33, %v3142_v40 }
 0x9bd   :  { %v2143_v18 = vmul.f32 %v3205_v46, %v3197_v49 }
 0x9be   :  { %2811 = vmatmul.mubr.msk.f32.vlgmr.msra.gmra.mrb[36].mxu1 %vm605_vm2, %v2142_v50  ;;  %3063 = vmatprep.subr.bf16.mxu1 %v3062_v29 }
 0x9bf   :  { %3065 = vmatpush3.bf16.msra.mxu1 %v3062_v29  ;;  %2817 = vmatprep.mubr.msk.f32.mxu1 %vm605_vm2, %v2143_v18 }
 0x9c0   :  { %v3207_v11 = vpop.eup %3206 }
 0x9c1   :  { %v2144_v13 = vmul.f32 %v3207_v11, %v3199_v39 }
 0x9c3   :  { %2818 = vmatmul.mubr.msk.f32.vlgmr.msra.gmra.mrb[38].mxu1 %vm605_vm2, %v2144_v13 }
 0xa91   :  { %v2812_v1 = vpop.f32.mrb[36].mxu1 }
 0xa92   :  { %v2225_v5 = vpop.f32.mrb[37].mxu1 }
 0xa93   :  { %2836 = vmatprep.mubr.msk.f32.mxu0 %vm430_vm0, %v2225_v5 }
 0xa94   :  { %2837 = vmatmul.mubr.msk.f32.vlgmr.msra.gmra.mrb[16].mxu0 %vm430_vm0, %v2812_v1 }
 0xa96   :  { %v2819_v28 = vpop.f32.mrb[38].mxu1 }
 0xa97   :  { %v2314_v8 = vpop.f32.mrb[39].mxu1 }
 0xa98   :  { %2839 = vmatprep.mubr.msk.f32.mxu0 %vm430_vm0, %v2314_v8 }
 0xa99   :  { %2840 = vmatmul.mubr.msk.f32.gmra.mrb[18].mxu0 %vm430_vm0, %v2819_v28 }
 0xb67   :  { %v2838_v42 = vpop.f32.mrb[16].mxu0 }
 0xb68   :  { %v2440_v55 = vadd.f32 %v2838_v42, %v2529_v14  ;;  %v2409_v60 = vpop.f32.mrb[17].mxu0 }
 0xb69   :  { %v2439_v31 = vadd.f32 %v2529_v14, %v2409_v60 }
 0xb6a   :  { %2444 = vst [vmem:[#allocation8 + $0x8] sm:$0xff] %v2440_v55 }
 0xb6b   :  { %2443 = vst [vmem:[#allocation8] sm:$0xff] %v2439_v31 }
 0xb6c   :  { %v2841_v6 = vpop.f32.mrb[18].mxu0 }
 0xb6d   :  { %v2442_v15 = vadd.f32 %v2841_v6, %v2529_v14  ;;  %v2419_v30 = vpop.f32.mrb[19].mxu0 }
 0xb6e   :  { %v2441_v43 = vadd.f32 %v2529_v14, %v2419_v30 }
 0xb6f   :  { %2446 = vst [vmem:[#allocation8 + $0x18] sm:$0xff] %v2442_v15 }
 0xb70   :  { %2445 = vst [vmem:[#allocation8 + $0x10] sm:$0xff] %v2441_v43 }
 0xb71   :  { %3285 = shalt.err (!%p3282_p0)
}
 0xb72   :  { %s3286_s7 = scalar_lea.hbm %s3727_s4, 512 }
 0xb73   :  { %p3287_p1 = scmp.ne.s32.totalorder %s3727_s4, %s3286_s7  ;;  %p3290_p2 = scmp.lt.u32.totalorder %s3286_s7, %s3727_s4 }
 0xb75   :  { %p3292_p3 = pnand %p3290_p2, %p3287_p1 }
 0xb77   :  { %3295 = shalt.err (!%p3292_p3)
}
 0xb78   :  { %2458 = dma.vmem_to_hbm [thread:$0]  %s2453_s30, 512, %s3727_s4, [#allocation4], %s3306_s1, %s3306_s1, %s3307_s13  }
 0xb79   :  { %3300 = dma.done.wait [#allocation4], 512  }
 0xb7a   :  { %3301 = vsyncadd [#allocation4], 4294966784 }
 0xb7b   :  { %2462 = vsyncpa [#allocation3], 1 }
 0xb7c   :  { %2463 = vsyncpa [#allocation6], 1 }
 0xb7d   :  { %2464 = vsyncpa [#allocation4], 1 }

</bundles_post_ra>
